<compile_context>
chip_gen: v7x
topology: tpu7x:2x2x1
jax: 0.10.0
libtpu: 0.0.40
codegen_flags: <defaults>
</compile_context>

<pallas_src>
import jax
import jax.numpy as jnp
import numpy as np
from jax.experimental import pallas as pl
from jax.experimental.pallas import tpu as pltpu

# ---------------- configuration (stands in for the configparser values) ------
BATCH_SIZE = 8          # batch_size  (also the in_features of dense2/dense3)
SEQ_LEN = 8             # sequence length of x
INPUT_SIZE = 16         # input_size
HIDDEN = 32             # lstm_hidden_size
LSTM_LAYERS = 2         # lstm_layers
OUTPUT_SIZE = 1         # lstm_output_size
T_REL = 4               # trailing dim of the (undefined-in-source) rel_weight


# ------------------------------ fused kernel ---------------------------------
def make_talstm_kernel(T, B, Din, H):
    """Fused kernel: skew-interleaved 2-layer LSTM + attention head, one call.

    Kernel ref layout (all VMEM, whole-array blocks):
      x_ref   (T*B, Din)      time-major, flattened
      w_ref   (Din+3H+8, 4H)  packed weight slab, gate columns [i, f, o, g]:
                 rows [0, Din)            Wih0
                 rows [Din, Din+H)        Whh0
                 rows [Din+H, Din+3H)     [Wih1; Whh1]
                 row  Din+3H              b0 = b_ih0 + b_hh0
                 row  Din+3H+1            b1 = b_ih1 + b_hh1
      h_ref   (B+H+8, H)      packed head slab:
                 rows [0, B)              w2 broadcast to (B, H)
                 rows [B, B+H)            rel_weight[:, :, -1].T
                 row  B+H                 wlin[0, :H]
                 row  B+H+1               wlin[0, H:]
                 row  B+H+2               b2 (lane-broadcast)
                 row  B+H+3               blin (lane-broadcast)
      out_ref (B, 1)
    """
    r_wih0 = 0
    r_whh0 = r_wih0 + Din
    r_w1 = r_whh0 + H
    r_bias = r_w1 + 2 * H
    r_w2 = 0
    r_rel = B
    r_misc = B + H

    def lstm_step(gates, c):
        # gate columns pre-permuted to [i, f, o | g]: one sigmoid + one tanh.
        ifo = jax.nn.sigmoid(gates[:, :3 * H])
        g = jnp.tanh(gates[:, 3 * H:])
        i_g = ifo[:, 0:H]
        f_g = ifo[:, H:2 * H]
        o_g = ifo[:, 2 * H:3 * H]
        c_new = f_g * c + i_g * g
        h_new = o_g * jnp.tanh(c_new)
        return h_new, c_new

    def kernel(x_ref, w_ref, h_ref, out_ref):
        # ---- carve the packed weight slab (static slices) -------------------
        wih0 = w_ref[r_wih0:r_whh0, :]                    # (Din, 4H)
        whh0 = w_ref[r_whh0:r_w1, :]                      # (H,   4H)
        w1 = w_ref[r_w1:r_bias, :]                        # (2H,  4H)
        b0 = w_ref[r_bias:r_bias + 1, :]                  # (1,   4H)
        b1 = w_ref[r_bias + 1:r_bias + 2, :]              # (1,   4H)

        # ---- layer-0 input projection: one hoisted MXU GEMM -----------------
        xw0 = jnp.dot(x_ref[...], wih0,
                      preferred_element_type=jnp.float32) + b0       # (T*B, 4H)

        # ---- skew-interleaved two-layer recurrence ---------------------------
        zeros = jnp.zeros((B, H), jnp.float32)
        h0, c0 = zeros, zeros
        h1, c1 = zeros, zeros
        for s in range(T + 1):                            # static unroll (T=8)
            h0_in = h0                                    # h0_{s-1}
            g0 = None
            g1 = None
            if s < T:                                     # layer-0 step s
                g0 = xw0[s * B:(s + 1) * B, :] + jnp.dot(
                    h0_in, whh0, preferred_element_type=jnp.float32)
            if s >= 1:                                    # layer-1 step s-1
                lhs1 = jnp.concatenate([h0_in, h1], axis=1)           # (B, 2H)
                g1 = jnp.dot(lhs1, w1,
                             preferred_element_type=jnp.float32) + b1
            if s < T:
                h0, c0 = lstm_step(g0, c0)
            if s >= 1:
                h1, c1 = lstm_step(g1, c1)

        feature = h1                                      # (B, H) = lstm_out[:, -1, :]

        # ---- attention head (tail branch dropped: softmax-invariant) --------
        w2b = h_ref[r_w2:r_w2 + B, 0:H]                   # (B, H)
        relT = h_ref[r_rel:r_rel + H, 0:H]                # (H, H)
        wlin_a = h_ref[r_misc:r_misc + 1, 0:H]            # (1, H)
        wlin_b = h_ref[r_misc + 1:r_misc + 2, 0:H]        # (1, H)
        b2 = h_ref[r_misc + 2:r_misc + 3, 0:H]            # (1, H) (constant row)
        blin = h_ref[r_misc + 3:r_misc + 4, 0:1]          # (1, 1)

        # dense2: featT @ w2 == sum over the batch (sublane) axis of feature*w2
        head_row = jnp.sum(feature * w2b, axis=0, keepdims=True) + b2     # (1, H)
        head_row = jnp.where(head_row >= 0.0, head_row, 0.2 * head_row)   # LeakyReLU(0.2)

        # transposed space: V = weight^T, so the original softmax over dim=0
        # becomes a softmax over V's lane axis; no transposes needed.
        v = head_row + relT                                               # (H, H)
        v = v - jnp.max(v, axis=1, keepdims=True)
        e = jnp.exp(v)
        denom = jnp.sum(e, axis=1, keepdims=True)
        vs = e * pl.reciprocal(denom, approx=True)                        # weight_s^T

        # proped^T = feature @ weight_s^T
        proped_t = jnp.dot(feature, vs,
                           preferred_element_type=jnp.float32)            # (B, H)

        # linear(cat([featT, proped], 0).T) with O == 1:
        # VPU broadcast-multiply + lane reduce (no N=1 MXU matmuls).
        out_ref[...] = (jnp.sum(feature * wlin_a + proped_t * wlin_b,
                                axis=1, keepdims=True) + blin)            # (B, 1)

    return kernel


# ------------------------------- host glue -----------------------------------
def _reorder_gates(w4h):
    """Reorder torch's [i, f, g, o] gate blocks (leading dim) to [i, f, o, g]."""
    H = HIDDEN
    return jnp.concatenate(
        [w4h[0:H], w4h[H:2 * H], w4h[3 * H:4 * H], w4h[2 * H:3 * H]], axis=0)


def talstm_forward(x, params):
    """x: (B, T, D) batch-first, like the PyTorch module.  Returns (B, O)."""
    B, T, D = x.shape
    H = HIDDEN
    O = params["wlin"].shape[0]
    assert LSTM_LAYERS == 2 and len(params["lstm"]) == 2
    assert O == 1, "output head is specialized to lstm_output_size == 1"
    assert B % 8 == 0 and D % 8 == 0 and H % 8 == 0

    # time-major, flattened activations (single DMA)
    x_flat = jnp.transpose(x, (1, 0, 2)).reshape(T * B, D)

    (w_ih0, w_hh0, b_ih0, b_hh0) = params["lstm"][0]
    (w_ih1, w_hh1, b_ih1, b_hh1) = params["lstm"][1]

    # --- weight slab: everything that feeds the MXU, lane-dense (*, 4H) ------
    wih0 = _reorder_gates(w_ih0).T                                     # (D,  4H)
    whh0 = _reorder_gates(w_hh0).T                                     # (H,  4H)
    b0 = _reorder_gates((b_ih0 + b_hh0)[:, None]).reshape(1, 4 * H)
    w1 = jnp.concatenate([_reorder_gates(w_ih1).T,
                          _reorder_gates(w_hh1).T], axis=0)            # (2H, 4H)
    b1 = _reorder_gates((b_ih1 + b_hh1)[:, None]).reshape(1, 4 * H)
    bias_blk = jnp.zeros((8, 4 * H), jnp.float32)
    bias_blk = bias_blk.at[0].set(b0[0]).at[1].set(b1[0])
    wslab = jnp.concatenate([wih0, whh0, w1, bias_blk], axis=0)        # (D+3H+8, 4H)

    # --- head slab: attention-head parameters, width H -----------------------
    w2b = jnp.broadcast_to(params["w2"].T, (B, H))                     # (B, H)
    relT = params["rel_weight"][:, :, -1].T                            # (H, H)
    misc = jnp.zeros((8, H), jnp.float32)
    misc = misc.at[0].set(params["wlin"][0, :H])
    misc = misc.at[1].set(params["wlin"][0, H:])
    misc = misc.at[2].set(jnp.full((H,), params["b2"][0], jnp.float32))
    misc = misc.at[3].set(jnp.full((H,), params["blin"][0], jnp.float32))
    hslab = jnp.concatenate([w2b, relT, misc], axis=0)                 # (B+H+8, H)

    vmem = pl.BlockSpec(memory_space=pltpu.MemorySpace.VMEM)
    return pl.pallas_call(
        make_talstm_kernel(T, B, D, H),
        out_shape=jax.ShapeDtypeStruct((B, O), jnp.float32),
        in_specs=[vmem, vmem, vmem],
        out_specs=vmem,
    )(x_flat, wslab, hslab)


# --------------------------- pure-JAX reference -------------------------------
def talstm_reference(x, params):
    """Faithful (shape-consistent) re-implementation of the PyTorch forward."""
    B, T, D = x.shape
    H = HIDDEN
    h_seq = jnp.transpose(x, (1, 0, 2))
    for (w_ih, w_hh, b_ih, b_hh) in params["lstm"]:
        h = jnp.zeros((B, H), jnp.float32)
        c = jnp.zeros((B, H), jnp.float32)
        outs = []
        for t in range(T):
            gates = h_seq[t] @ w_ih.T + h @ w_hh.T + b_ih + b_hh
            i = jax.nn.sigmoid(gates[:, 0 * H:1 * H])
            f = jax.nn.sigmoid(gates[:, 1 * H:2 * H])
            g = jnp.tanh(gates[:, 2 * H:3 * H])
            o = jax.nn.sigmoid(gates[:, 3 * H:4 * H])
            c = f * c + i * g
            h = o * jnp.tanh(c)
            outs.append(h)
        h_seq = jnp.stack(outs, axis=0)
    featT = h_seq[-1].T                                     # (H, B)
    head = featT @ params["w2"].T + params["b2"]
    head = jnp.where(head >= 0, head, 0.2 * head)
    tail = featT @ params["w3"].T + params["b3"]
    tail = jnp.where(tail >= 0, tail, 0.2 * tail)
    ones = jnp.ones((H, 1), jnp.float32)
    weight = head @ ones.T + ones @ tail.T + params["rel_weight"][:, :, -1]
    weight = jax.nn.softmax(weight, axis=0)
    proped = weight @ featT
    cat = jnp.concatenate([featT, proped], axis=0)
    return cat.T @ params["wlin"].T + params["blin"]


# ------------------------------ parameter init --------------------------------
def init_params(key):
    k = 1.0 / np.sqrt(HIDDEN)
    keys = iter(jax.random.split(key, 64))
    lstm_params = []
    in_size = INPUT_SIZE
    for _ in range(LSTM_LAYERS):
        w_ih = jax.random.uniform(next(keys), (4 * HIDDEN, in_size),
                                  jnp.float32, -k, k)
        w_hh = jax.random.uniform(next(keys), (4 * HIDDEN, HIDDEN),
                                  jnp.float32, -k, k)
        b_ih = jax.random.uniform(next(keys), (4 * HIDDEN,), jnp.float32, -k, k)
        b_hh = jax.random.uniform(next(keys), (4 * HIDDEN,), jnp.float32, -k, k)
        lstm_params.append((w_ih, w_hh, b_ih, b_hh))
        in_size = HIDDEN
    kb = 1.0 / np.sqrt(BATCH_SIZE)
    kl = 1.0 / np.sqrt(2 * HIDDEN)
    return {
        "lstm": lstm_params,
        "w2": jax.random.uniform(next(keys), (1, BATCH_SIZE), jnp.float32, -kb, kb),
        "b2": jax.random.uniform(next(keys), (1,), jnp.float32, -kb, kb),
        "w3": jax.random.uniform(next(keys), (1, BATCH_SIZE), jnp.float32, -kb, kb),
        "b3": jax.random.uniform(next(keys), (1,), jnp.float32, -kb, kb),
        "wlin": jax.random.uniform(next(keys), (OUTPUT_SIZE, 2 * HIDDEN),
                                   jnp.float32, -kl, kl),
        "blin": jax.random.uniform(next(keys), (OUTPUT_SIZE,), jnp.float32, -kl, kl),
        "rel_weight": jax.random.normal(next(keys), (HIDDEN, HIDDEN, T_REL),
                                        jnp.float32),
    }


if __name__ == "__main__":
    key = jax.random.PRNGKey(0)
    k_x, k_p = jax.random.split(key)
    x = jax.random.normal(k_x, (BATCH_SIZE, SEQ_LEN, INPUT_SIZE), jnp.float32)
    params = init_params(k_p)

    fwd = jax.jit(talstm_forward)
    out = jax.block_until_ready(fwd(x, params))
    ref = jax.block_until_ready(talstm_reference(x, params))

    assert out.shape == (BATCH_SIZE, OUTPUT_SIZE), out.shape
    # slightly relaxed tolerance: kernel uses EUP approximate reciprocal in the
    # softmax and drops the softmax-invariant tail term.
    np.testing.assert_allclose(np.asarray(out), np.asarray(ref),
                               rtol=2e-3, atol=2e-3)
    print("KERNEL_OK")
</pallas_src>

<mosaic_0001>
module attributes {stable_mosaic.version = 11 : i64} {
  func.func @kernel(%arg0: memref<64x16xf32, #tpu.memory_space<vmem>>, %arg1: memref<120x128xf32, #tpu.memory_space<vmem>>, %arg2: memref<48x32xf32, #tpu.memory_space<vmem>>, %arg3: memref<8x1xf32, #tpu.memory_space<vmem>>) attributes {dimension_semantics = [], scalar_prefetch = 0 : i64, scratch_operands = 0 : i64, tpu.core_type = #tpu.core_type<tc>} {
    %c0 = arith.constant 0 : index
    %c0_0 = arith.constant 0 : index
    %0 = vector.load %arg1[%c0, %c0_0] : memref<120x128xf32, #tpu.memory_space<vmem>>, vector<16x128xf32>
    %c16 = arith.constant 16 : index
    %c0_1 = arith.constant 0 : index
    %1 = vector.load %arg1[%c16, %c0_1] : memref<120x128xf32, #tpu.memory_space<vmem>>, vector<32x128xf32>
    %c48 = arith.constant 48 : index
    %c0_2 = arith.constant 0 : index
    %2 = vector.load %arg1[%c48, %c0_2] : memref<120x128xf32, #tpu.memory_space<vmem>>, vector<64x128xf32>
    %c112 = arith.constant 112 : index
    %c0_3 = arith.constant 0 : index
    %3 = vector.load %arg1[%c112, %c0_3] : memref<120x128xf32, #tpu.memory_space<vmem>>, vector<1x128xf32>
    %c113 = arith.constant 113 : index
    %c0_4 = arith.constant 0 : index
    %4 = vector.load %arg1[%c113, %c0_4] : memref<120x128xf32, #tpu.memory_space<vmem>>, vector<1x128xf32>
    %c0_5 = arith.constant 0 : index
    %c0_6 = arith.constant 0 : index
    %5 = vector.load %arg0[%c0_5, %c0_6] : memref<64x16xf32, #tpu.memory_space<vmem>>, vector<64x16xf32>
    %cst = arith.constant dense<0.000000e+00> : vector<64x128xf32>
    %6 = tpu.matmul %5, %0, %cst {dimension_numbers = #tpu.dot_dimension_numbers<[1], [0], [0], [1], [0, 0, 1, 1], [], []>} : vector<64x16xf32>, vector<16x128xf32>, vector<64x128xf32> -> vector<64x128xf32>
    %7 = vector.broadcast %3 : vector<1x128xf32> to vector<64x128xf32>
    %8 = arith.addf %6, %7 : vector<64x128xf32>
    %cst_7 = arith.constant 0.000000e+00 : f32
    %9 = vector.broadcast %cst_7 : f32 to vector<8x32xf32>
    %10 = vector.extract_strided_slice %8 {offsets = [0, 0], sizes = [8, 128], strides = [1, 1]} : vector<64x128xf32> to vector<8x128xf32>
    %cst_8 = arith.constant dense<0.000000e+00> : vector<8x128xf32>
    %11 = tpu.matmul %9, %1, %cst_8 {dimension_numbers = #tpu.dot_dimension_numbers<[1], [0], [0], [1], [0, 0, 1, 1], [], []>} : vector<8x32xf32>, vector<32x128xf32>, vector<8x128xf32> -> vector<8x128xf32>
    %12 = arith.addf %10, %11 : vector<8x128xf32>
    %13 = vector.extract_strided_slice %12 {offsets = [0, 0], sizes = [8, 96], strides = [1, 1]} : vector<8x128xf32> to vector<8x96xf32>
    %14 = arith.negf %13 : vector<8x96xf32>
    %15 = math.exp %14 : vector<8x96xf32>
    %cst_9 = arith.constant 1.000000e+00 : f32
    %16 = vector.broadcast %cst_9 : f32 to vector<8x96xf32>
    %17 = arith.addf %16, %15 : vector<8x96xf32>
    %18 = arith.divf %16, %17 : vector<8x96xf32>
    %19 = vector.extract_strided_slice %12 {offsets = [0, 96], sizes = [8, 32], strides = [1, 1]} : vector<8x128xf32> to vector<8x32xf32>
    %20 = math.tanh %19 : vector<8x32xf32>
    %21 = vector.extract_strided_slice %18 {offsets = [0, 0], sizes = [8, 32], strides = [1, 1]} : vector<8x96xf32> to vector<8x32xf32>
    %22 = vector.extract_strided_slice %18 {offsets = [0, 32], sizes = [8, 32], strides = [1, 1]} : vector<8x96xf32> to vector<8x32xf32>
    %23 = vector.extract_strided_slice %18 {offsets = [0, 64], sizes = [8, 32], strides = [1, 1]} : vector<8x96xf32> to vector<8x32xf32>
    %24 = arith.mulf %22, %9 : vector<8x32xf32>
    %25 = arith.mulf %21, %20 : vector<8x32xf32>
    %26 = arith.addf %24, %25 : vector<8x32xf32>
    %27 = math.tanh %26 : vector<8x32xf32>
    %28 = arith.mulf %23, %27 : vector<8x32xf32>
    %29 = vector.extract_strided_slice %8 {offsets = [8, 0], sizes = [8, 128], strides = [1, 1]} : vector<64x128xf32> to vector<8x128xf32>
    %cst_10 = arith.constant dense<0.000000e+00> : vector<8x128xf32>
    %30 = tpu.matmul %28, %1, %cst_10 {dimension_numbers = #tpu.dot_dimension_numbers<[1], [0], [0], [1], [0, 0, 1, 1], [], []>} : vector<8x32xf32>, vector<32x128xf32>, vector<8x128xf32> -> vector<8x128xf32>
    %31 = arith.addf %29, %30 : vector<8x128xf32>
    %32 = tpu.concatenate %28, %9 in 1 : vector<8x32xf32>, vector<8x32xf32> -> vector<8x64xf32>
    %cst_11 = arith.constant dense<0.000000e+00> : vector<8x128xf32>
    %33 = tpu.matmul %32, %2, %cst_11 {dimension_numbers = #tpu.dot_dimension_numbers<[1], [0], [0], [1], [0, 0, 1, 1], [], []>} : vector<8x64xf32>, vector<64x128xf32>, vector<8x128xf32> -> vector<8x128xf32>
    %34 = vector.broadcast %4 : vector<1x128xf32> to vector<8x128xf32>
    %35 = arith.addf %33, %34 : vector<8x128xf32>
    %36 = vector.extract_strided_slice %31 {offsets = [0, 0], sizes = [8, 96], strides = [1, 1]} : vector<8x128xf32> to vector<8x96xf32>
    %37 = arith.negf %36 : vector<8x96xf32>
    %38 = math.exp %37 : vector<8x96xf32>
    %cst_12 = arith.constant 1.000000e+00 : f32
    %39 = vector.broadcast %cst_12 : f32 to vector<8x96xf32>
    %40 = arith.addf %39, %38 : vector<8x96xf32>
    %41 = arith.divf %39, %40 : vector<8x96xf32>
    %42 = vector.extract_strided_slice %31 {offsets = [0, 96], sizes = [8, 32], strides = [1, 1]} : vector<8x128xf32> to vector<8x32xf32>
    %43 = math.tanh %42 : vector<8x32xf32>
    %44 = vector.extract_strided_slice %41 {offsets = [0, 0], sizes = [8, 32], strides = [1, 1]} : vector<8x96xf32> to vector<8x32xf32>
    %45 = vector.extract_strided_slice %41 {offsets = [0, 32], sizes = [8, 32], strides = [1, 1]} : vector<8x96xf32> to vector<8x32xf32>
    %46 = vector.extract_strided_slice %41 {offsets = [0, 64], sizes = [8, 32], strides = [1, 1]} : vector<8x96xf32> to vector<8x32xf32>
    %47 = arith.mulf %45, %26 : vector<8x32xf32>
    %48 = arith.mulf %44, %43 : vector<8x32xf32>
    %49 = arith.addf %47, %48 : vector<8x32xf32>
    %50 = math.tanh %49 : vector<8x32xf32>
    %51 = arith.mulf %46, %50 : vector<8x32xf32>
    %52 = vector.extract_strided_slice %35 {offsets = [0, 0], sizes = [8, 96], strides = [1, 1]} : vector<8x128xf32> to vector<8x96xf32>
    %53 = arith.negf %52 : vector<8x96xf32>
    %54 = math.exp %53 : vector<8x96xf32>
    %cst_13 = arith.constant 1.000000e+00 : f32
    %55 = vector.broadcast %cst_13 : f32 to vector<8x96xf32>
    %56 = arith.addf %55, %54 : vector<8x96xf32>
    %57 = arith.divf %55, %56 : vector<8x96xf32>
    %58 = vector.extract_strided_slice %35 {offsets = [0, 96], sizes = [8, 32], strides = [1, 1]} : vector<8x128xf32> to vector<8x32xf32>
    %59 = math.tanh %58 : vector<8x32xf32>
    %60 = vector.extract_strided_slice %57 {offsets = [0, 0], sizes = [8, 32], strides = [1, 1]} : vector<8x96xf32> to vector<8x32xf32>
    %61 = vector.extract_strided_slice %57 {offsets = [0, 32], sizes = [8, 32], strides = [1, 1]} : vector<8x96xf32> to vector<8x32xf32>
    %62 = vector.extract_strided_slice %57 {offsets = [0, 64], sizes = [8, 32], strides = [1, 1]} : vector<8x96xf32> to vector<8x32xf32>
    %63 = arith.mulf %61, %9 : vector<8x32xf32>
    %64 = arith.mulf %60, %59 : vector<8x32xf32>
    %65 = arith.addf %63, %64 : vector<8x32xf32>
    %66 = math.tanh %65 : vector<8x32xf32>
    %67 = arith.mulf %62, %66 : vector<8x32xf32>
    %68 = vector.extract_strided_slice %8 {offsets = [16, 0], sizes = [8, 128], strides = [1, 1]} : vector<64x128xf32> to vector<8x128xf32>
    %cst_14 = arith.constant dense<0.000000e+00> : vector<8x128xf32>
    %69 = tpu.matmul %51, %1, %cst_14 {dimension_numbers = #tpu.dot_dimension_numbers<[1], [0], [0], [1], [0, 0, 1, 1], [], []>} : vector<8x32xf32>, vector<32x128xf32>, vector<8x128xf32> -> vector<8x128xf32>
    %70 = arith.addf %68, %69 : vector<8x128xf32>
    %71 = tpu.concatenate %51, %67 in 1 : vector<8x32xf32>, vector<8x32xf32> -> vector<8x64xf32>
    %cst_15 = arith.constant dense<0.000000e+00> : vector<8x128xf32>
    %72 = tpu.matmul %71, %2, %cst_15 {dimension_numbers = #tpu.dot_dimension_numbers<[1], [0], [0], [1], [0, 0, 1, 1], [], []>} : vector<8x64xf32>, vector<64x128xf32>, vector<8x128xf32> -> vector<8x128xf32>
    %73 = vector.broadcast %4 : vector<1x128xf32> to vector<8x128xf32>
    %74 = arith.addf %72, %73 : vector<8x128xf32>
    %75 = vector.extract_strided_slice %70 {offsets = [0, 0], sizes = [8, 96], strides = [1, 1]} : vector<8x128xf32> to vector<8x96xf32>
    %76 = arith.negf %75 : vector<8x96xf32>
    %77 = math.exp %76 : vector<8x96xf32>
    %cst_16 = arith.constant 1.000000e+00 : f32
    %78 = vector.broadcast %cst_16 : f32 to vector<8x96xf32>
    %79 = arith.addf %78, %77 : vector<8x96xf32>
    %80 = arith.divf %78, %79 : vector<8x96xf32>
    %81 = vector.extract_strided_slice %70 {offsets = [0, 96], sizes = [8, 32], strides = [1, 1]} : vector<8x128xf32> to vector<8x32xf32>
    %82 = math.tanh %81 : vector<8x32xf32>
    %83 = vector.extract_strided_slice %80 {offsets = [0, 0], sizes = [8, 32], strides = [1, 1]} : vector<8x96xf32> to vector<8x32xf32>
    %84 = vector.extract_strided_slice %80 {offsets = [0, 32], sizes = [8, 32], strides = [1, 1]} : vector<8x96xf32> to vector<8x32xf32>
    %85 = vector.extract_strided_slice %80 {offsets = [0, 64], sizes = [8, 32], strides = [1, 1]} : vector<8x96xf32> to vector<8x32xf32>
    %86 = arith.mulf %84, %49 : vector<8x32xf32>
    %87 = arith.mulf %83, %82 : vector<8x32xf32>
    %88 = arith.addf %86, %87 : vector<8x32xf32>
    %89 = math.tanh %88 : vector<8x32xf32>
    %90 = arith.mulf %85, %89 : vector<8x32xf32>
    %91 = vector.extract_strided_slice %74 {offsets = [0, 0], sizes = [8, 96], strides = [1, 1]} : vector<8x128xf32> to vector<8x96xf32>
    %92 = arith.negf %91 : vector<8x96xf32>
    %93 = math.exp %92 : vector<8x96xf32>
    %cst_17 = arith.constant 1.000000e+00 : f32
    %94 = vector.broadcast %cst_17 : f32 to vector<8x96xf32>
    %95 = arith.addf %94, %93 : vector<8x96xf32>
    %96 = arith.divf %94, %95 : vector<8x96xf32>
    %97 = vector.extract_strided_slice %74 {offsets = [0, 96], sizes = [8, 32], strides = [1, 1]} : vector<8x128xf32> to vector<8x32xf32>
    %98 = math.tanh %97 : vector<8x32xf32>
    %99 = vector.extract_strided_slice %96 {offsets = [0, 0], sizes = [8, 32], strides = [1, 1]} : vector<8x96xf32> to vector<8x32xf32>
    %100 = vector.extract_strided_slice %96 {offsets = [0, 32], sizes = [8, 32], strides = [1, 1]} : vector<8x96xf32> to vector<8x32xf32>
    %101 = vector.extract_strided_slice %96 {offsets = [0, 64], sizes = [8, 32], strides = [1, 1]} : vector<8x96xf32> to vector<8x32xf32>
    %102 = arith.mulf %100, %65 : vector<8x32xf32>
    %103 = arith.mulf %99, %98 : vector<8x32xf32>
    %104 = arith.addf %102, %103 : vector<8x32xf32>
    %105 = math.tanh %104 : vector<8x32xf32>
    %106 = arith.mulf %101, %105 : vector<8x32xf32>
    %107 = vector.extract_strided_slice %8 {offsets = [24, 0], sizes = [8, 128], strides = [1, 1]} : vector<64x128xf32> to vector<8x128xf32>
    %cst_18 = arith.constant dense<0.000000e+00> : vector<8x128xf32>
    %108 = tpu.matmul %90, %1, %cst_18 {dimension_numbers = #tpu.dot_dimension_numbers<[1], [0], [0], [1], [0, 0, 1, 1], [], []>} : vector<8x32xf32>, vector<32x128xf32>, vector<8x128xf32> -> vector<8x128xf32>
    %109 = arith.addf %107, %108 : vector<8x128xf32>
    %110 = tpu.concatenate %90, %106 in 1 : vector<8x32xf32>, vector<8x32xf32> -> vector<8x64xf32>
    %cst_19 = arith.constant dense<0.000000e+00> : vector<8x128xf32>
    %111 = tpu.matmul %110, %2, %cst_19 {dimension_numbers = #tpu.dot_dimension_numbers<[1], [0], [0], [1], [0, 0, 1, 1], [], []>} : vector<8x64xf32>, vector<64x128xf32>, vector<8x128xf32> -> vector<8x128xf32>
    %112 = vector.broadcast %4 : vector<1x128xf32> to vector<8x128xf32>
    %113 = arith.addf %111, %112 : vector<8x128xf32>
    %114 = vector.extract_strided_slice %109 {offsets = [0, 0], sizes = [8, 96], strides = [1, 1]} : vector<8x128xf32> to vector<8x96xf32>
    %115 = arith.negf %114 : vector<8x96xf32>
    %116 = math.exp %115 : vector<8x96xf32>
    %cst_20 = arith.constant 1.000000e+00 : f32
    %117 = vector.broadcast %cst_20 : f32 to vector<8x96xf32>
    %118 = arith.addf %117, %116 : vector<8x96xf32>
    %119 = arith.divf %117, %118 : vector<8x96xf32>
    %120 = vector.extract_strided_slice %109 {offsets = [0, 96], sizes = [8, 32], strides = [1, 1]} : vector<8x128xf32> to vector<8x32xf32>
    %121 = math.tanh %120 : vector<8x32xf32>
    %122 = vector.extract_strided_slice %119 {offsets = [0, 0], sizes = [8, 32], strides = [1, 1]} : vector<8x96xf32> to vector<8x32xf32>
    %123 = vector.extract_strided_slice %119 {offsets = [0, 32], sizes = [8, 32], strides = [1, 1]} : vector<8x96xf32> to vector<8x32xf32>
    %124 = vector.extract_strided_slice %119 {offsets = [0, 64], sizes = [8, 32], strides = [1, 1]} : vector<8x96xf32> to vector<8x32xf32>
    %125 = arith.mulf %123, %88 : vector<8x32xf32>
    %126 = arith.mulf %122, %121 : vector<8x32xf32>
    %127 = arith.addf %125, %126 : vector<8x32xf32>
    %128 = math.tanh %127 : vector<8x32xf32>
    %129 = arith.mulf %124, %128 : vector<8x32xf32>
    %130 = vector.extract_strided_slice %113 {offsets = [0, 0], sizes = [8, 96], strides = [1, 1]} : vector<8x128xf32> to vector<8x96xf32>
    %131 = arith.negf %130 : vector<8x96xf32>
    %132 = math.exp %131 : vector<8x96xf32>
    %cst_21 = arith.constant 1.000000e+00 : f32
    %133 = vector.broadcast %cst_21 : f32 to vector<8x96xf32>
    %134 = arith.addf %133, %132 : vector<8x96xf32>
    %135 = arith.divf %133, %134 : vector<8x96xf32>
    %136 = vector.extract_strided_slice %113 {offsets = [0, 96], sizes = [8, 32], strides = [1, 1]} : vector<8x128xf32> to vector<8x32xf32>
    %137 = math.tanh %136 : vector<8x32xf32>
    %138 = vector.extract_strided_slice %135 {offsets = [0, 0], sizes = [8, 32], strides = [1, 1]} : vector<8x96xf32> to vector<8x32xf32>
    %139 = vector.extract_strided_slice %135 {offsets = [0, 32], sizes = [8, 32], strides = [1, 1]} : vector<8x96xf32> to vector<8x32xf32>
    %140 = vector.extract_strided_slice %135 {offsets = [0, 64], sizes = [8, 32], strides = [1, 1]} : vector<8x96xf32> to vector<8x32xf32>
    %141 = arith.mulf %139, %104 : vector<8x32xf32>
    %142 = arith.mulf %138, %137 : vector<8x32xf32>
    %143 = arith.addf %141, %142 : vector<8x32xf32>
    %144 = math.tanh %143 : vector<8x32xf32>
    %145 = arith.mulf %140, %144 : vector<8x32xf32>
    %146 = vector.extract_strided_slice %8 {offsets = [32, 0], sizes = [8, 128], strides = [1, 1]} : vector<64x128xf32> to vector<8x128xf32>
    %cst_22 = arith.constant dense<0.000000e+00> : vector<8x128xf32>
    %147 = tpu.matmul %129, %1, %cst_22 {dimension_numbers = #tpu.dot_dimension_numbers<[1], [0], [0], [1], [0, 0, 1, 1], [], []>} : vector<8x32xf32>, vector<32x128xf32>, vector<8x128xf32> -> vector<8x128xf32>
    %148 = arith.addf %146, %147 : vector<8x128xf32>
    %149 = tpu.concatenate %129, %145 in 1 : vector<8x32xf32>, vector<8x32xf32> -> vector<8x64xf32>
    %cst_23 = arith.constant dense<0.000000e+00> : vector<8x128xf32>
    %150 = tpu.matmul %149, %2, %cst_23 {dimension_numbers = #tpu.dot_dimension_numbers<[1], [0], [0], [1], [0, 0, 1, 1], [], []>} : vector<8x64xf32>, vector<64x128xf32>, vector<8x128xf32> -> vector<8x128xf32>
    %151 = vector.broadcast %4 : vector<1x128xf32> to vector<8x128xf32>
    %152 = arith.addf %150, %151 : vector<8x128xf32>
    %153 = vector.extract_strided_slice %148 {offsets = [0, 0], sizes = [8, 96], strides = [1, 1]} : vector<8x128xf32> to vector<8x96xf32>
    %154 = arith.negf %153 : vector<8x96xf32>
    %155 = math.exp %154 : vector<8x96xf32>
    %cst_24 = arith.constant 1.000000e+00 : f32
    %156 = vector.broadcast %cst_24 : f32 to vector<8x96xf32>
    %157 = arith.addf %156, %155 : vector<8x96xf32>
    %158 = arith.divf %156, %157 : vector<8x96xf32>
    %159 = vector.extract_strided_slice %148 {offsets = [0, 96], sizes = [8, 32], strides = [1, 1]} : vector<8x128xf32> to vector<8x32xf32>
    %160 = math.tanh %159 : vector<8x32xf32>
    %161 = vector.extract_strided_slice %158 {offsets = [0, 0], sizes = [8, 32], strides = [1, 1]} : vector<8x96xf32> to vector<8x32xf32>
    %162 = vector.extract_strided_slice %158 {offsets = [0, 32], sizes = [8, 32], strides = [1, 1]} : vector<8x96xf32> to vector<8x32xf32>
    %163 = vector.extract_strided_slice %158 {offsets = [0, 64], sizes = [8, 32], strides = [1, 1]} : vector<8x96xf32> to vector<8x32xf32>
    %164 = arith.mulf %162, %127 : vector<8x32xf32>
    %165 = arith.mulf %161, %160 : vector<8x32xf32>
    %166 = arith.addf %164, %165 : vector<8x32xf32>
    %167 = math.tanh %166 : vector<8x32xf32>
    %168 = arith.mulf %163, %167 : vector<8x32xf32>
    %169 = vector.extract_strided_slice %152 {offsets = [0, 0], sizes = [8, 96], strides = [1, 1]} : vector<8x128xf32> to vector<8x96xf32>
    %170 = arith.negf %169 : vector<8x96xf32>
    %171 = math.exp %170 : vector<8x96xf32>
    %cst_25 = arith.constant 1.000000e+00 : f32
    %172 = vector.broadcast %cst_25 : f32 to vector<8x96xf32>
    %173 = arith.addf %172, %171 : vector<8x96xf32>
    %174 = arith.divf %172, %173 : vector<8x96xf32>
    %175 = vector.extract_strided_slice %152 {offsets = [0, 96], sizes = [8, 32], strides = [1, 1]} : vector<8x128xf32> to vector<8x32xf32>
    %176 = math.tanh %175 : vector<8x32xf32>
    %177 = vector.extract_strided_slice %174 {offsets = [0, 0], sizes = [8, 32], strides = [1, 1]} : vector<8x96xf32> to vector<8x32xf32>
    %178 = vector.extract_strided_slice %174 {offsets = [0, 32], sizes = [8, 32], strides = [1, 1]} : vector<8x96xf32> to vector<8x32xf32>
    %179 = vector.extract_strided_slice %174 {offsets = [0, 64], sizes = [8, 32], strides = [1, 1]} : vector<8x96xf32> to vector<8x32xf32>
    %180 = arith.mulf %178, %143 : vector<8x32xf32>
    %181 = arith.mulf %177, %176 : vector<8x32xf32>
    %182 = arith.addf %180, %181 : vector<8x32xf32>
    %183 = math.tanh %182 : vector<8x32xf32>
    %184 = arith.mulf %179, %183 : vector<8x32xf32>
    %185 = vector.extract_strided_slice %8 {offsets = [40, 0], sizes = [8, 128], strides = [1, 1]} : vector<64x128xf32> to vector<8x128xf32>
    %cst_26 = arith.constant dense<0.000000e+00> : vector<8x128xf32>
    %186 = tpu.matmul %168, %1, %cst_26 {dimension_numbers = #tpu.dot_dimension_numbers<[1], [0], [0], [1], [0, 0, 1, 1], [], []>} : vector<8x32xf32>, vector<32x128xf32>, vector<8x128xf32> -> vector<8x128xf32>
    %187 = arith.addf %185, %186 : vector<8x128xf32>
    %188 = tpu.concatenate %168, %184 in 1 : vector<8x32xf32>, vector<8x32xf32> -> vector<8x64xf32>
    %cst_27 = arith.constant dense<0.000000e+00> : vector<8x128xf32>
    %189 = tpu.matmul %188, %2, %cst_27 {dimension_numbers = #tpu.dot_dimension_numbers<[1], [0], [0], [1], [0, 0, 1, 1], [], []>} : vector<8x64xf32>, vector<64x128xf32>, vector<8x128xf32> -> vector<8x128xf32>
    %190 = vector.broadcast %4 : vector<1x128xf32> to vector<8x128xf32>
    %191 = arith.addf %189, %190 : vector<8x128xf32>
    %192 = vector.extract_strided_slice %187 {offsets = [0, 0], sizes = [8, 96], strides = [1, 1]} : vector<8x128xf32> to vector<8x96xf32>
    %193 = arith.negf %192 : vector<8x96xf32>
    %194 = math.exp %193 : vector<8x96xf32>
    %cst_28 = arith.constant 1.000000e+00 : f32
    %195 = vector.broadcast %cst_28 : f32 to vector<8x96xf32>
    %196 = arith.addf %195, %194 : vector<8x96xf32>
    %197 = arith.divf %195, %196 : vector<8x96xf32>
    %198 = vector.extract_strided_slice %187 {offsets = [0, 96], sizes = [8, 32], strides = [1, 1]} : vector<8x128xf32> to vector<8x32xf32>
    %199 = math.tanh %198 : vector<8x32xf32>
    %200 = vector.extract_strided_slice %197 {offsets = [0, 0], sizes = [8, 32], strides = [1, 1]} : vector<8x96xf32> to vector<8x32xf32>
    %201 = vector.extract_strided_slice %197 {offsets = [0, 32], sizes = [8, 32], strides = [1, 1]} : vector<8x96xf32> to vector<8x32xf32>
    %202 = vector.extract_strided_slice %197 {offsets = [0, 64], sizes = [8, 32], strides = [1, 1]} : vector<8x96xf32> to vector<8x32xf32>
    %203 = arith.mulf %201, %166 : vector<8x32xf32>
    %204 = arith.mulf %200, %199 : vector<8x32xf32>
    %205 = arith.addf %203, %204 : vector<8x32xf32>
    %206 = math.tanh %205 : vector<8x32xf32>
    %207 = arith.mulf %202, %206 : vector<8x32xf32>
    %208 = vector.extract_strided_slice %191 {offsets = [0, 0], sizes = [8, 96], strides = [1, 1]} : vector<8x128xf32> to vector<8x96xf32>
    %209 = arith.negf %208 : vector<8x96xf32>
    %210 = math.exp %209 : vector<8x96xf32>
    %cst_29 = arith.constant 1.000000e+00 : f32
    %211 = vector.broadcast %cst_29 : f32 to vector<8x96xf32>
    %212 = arith.addf %211, %210 : vector<8x96xf32>
    %213 = arith.divf %211, %212 : vector<8x96xf32>
    %214 = vector.extract_strided_slice %191 {offsets = [0, 96], sizes = [8, 32], strides = [1, 1]} : vector<8x128xf32> to vector<8x32xf32>
    %215 = math.tanh %214 : vector<8x32xf32>
    %216 = vector.extract_strided_slice %213 {offsets = [0, 0], sizes = [8, 32], strides = [1, 1]} : vector<8x96xf32> to vector<8x32xf32>
    %217 = vector.extract_strided_slice %213 {offsets = [0, 32], sizes = [8, 32], strides = [1, 1]} : vector<8x96xf32> to vector<8x32xf32>
    %218 = vector.extract_strided_slice %213 {offsets = [0, 64], sizes = [8, 32], strides = [1, 1]} : vector<8x96xf32> to vector<8x32xf32>
    %219 = arith.mulf %217, %182 : vector<8x32xf32>
    %220 = arith.mulf %216, %215 : vector<8x32xf32>
    %221 = arith.addf %219, %220 : vector<8x32xf32>
    %222 = math.tanh %221 : vector<8x32xf32>
    %223 = arith.mulf %218, %222 : vector<8x32xf32>
    %224 = vector.extract_strided_slice %8 {offsets = [48, 0], sizes = [8, 128], strides = [1, 1]} : vector<64x128xf32> to vector<8x128xf32>
    %cst_30 = arith.constant dense<0.000000e+00> : vector<8x128xf32>
    %225 = tpu.matmul %207, %1, %cst_30 {dimension_numbers = #tpu.dot_dimension_numbers<[1], [0], [0], [1], [0, 0, 1, 1], [], []>} : vector<8x32xf32>, vector<32x128xf32>, vector<8x128xf32> -> vector<8x128xf32>
    %226 = arith.addf %224, %225 : vector<8x128xf32>
    %227 = tpu.concatenate %207, %223 in 1 : vector<8x32xf32>, vector<8x32xf32> -> vector<8x64xf32>
    %cst_31 = arith.constant dense<0.000000e+00> : vector<8x128xf32>
    %228 = tpu.matmul %227, %2, %cst_31 {dimension_numbers = #tpu.dot_dimension_numbers<[1], [0], [0], [1], [0, 0, 1, 1], [], []>} : vector<8x64xf32>, vector<64x128xf32>, vector<8x128xf32> -> vector<8x128xf32>
    %229 = vector.broadcast %4 : vector<1x128xf32> to vector<8x128xf32>
    %230 = arith.addf %228, %229 : vector<8x128xf32>
    %231 = vector.extract_strided_slice %226 {offsets = [0, 0], sizes = [8, 96], strides = [1, 1]} : vector<8x128xf32> to vector<8x96xf32>
    %232 = arith.negf %231 : vector<8x96xf32>
    %233 = math.exp %232 : vector<8x96xf32>
    %cst_32 = arith.constant 1.000000e+00 : f32
    %234 = vector.broadcast %cst_32 : f32 to vector<8x96xf32>
    %235 = arith.addf %234, %233 : vector<8x96xf32>
    %236 = arith.divf %234, %235 : vector<8x96xf32>
    %237 = vector.extract_strided_slice %226 {offsets = [0, 96], sizes = [8, 32], strides = [1, 1]} : vector<8x128xf32> to vector<8x32xf32>
    %238 = math.tanh %237 : vector<8x32xf32>
    %239 = vector.extract_strided_slice %236 {offsets = [0, 0], sizes = [8, 32], strides = [1, 1]} : vector<8x96xf32> to vector<8x32xf32>
    %240 = vector.extract_strided_slice %236 {offsets = [0, 32], sizes = [8, 32], strides = [1, 1]} : vector<8x96xf32> to vector<8x32xf32>
    %241 = vector.extract_strided_slice %236 {offsets = [0, 64], sizes = [8, 32], strides = [1, 1]} : vector<8x96xf32> to vector<8x32xf32>
    %242 = arith.mulf %240, %205 : vector<8x32xf32>
    %243 = arith.mulf %239, %238 : vector<8x32xf32>
    %244 = arith.addf %242, %243 : vector<8x32xf32>
    %245 = math.tanh %244 : vector<8x32xf32>
    %246 = arith.mulf %241, %245 : vector<8x32xf32>
    %247 = vector.extract_strided_slice %230 {offsets = [0, 0], sizes = [8, 96], strides = [1, 1]} : vector<8x128xf32> to vector<8x96xf32>
    %248 = arith.negf %247 : vector<8x96xf32>
    %249 = math.exp %248 : vector<8x96xf32>
    %cst_33 = arith.constant 1.000000e+00 : f32
    %250 = vector.broadcast %cst_33 : f32 to vector<8x96xf32>
    %251 = arith.addf %250, %249 : vector<8x96xf32>
    %252 = arith.divf %250, %251 : vector<8x96xf32>
    %253 = vector.extract_strided_slice %230 {offsets = [0, 96], sizes = [8, 32], strides = [1, 1]} : vector<8x128xf32> to vector<8x32xf32>
    %254 = math.tanh %253 : vector<8x32xf32>
    %255 = vector.extract_strided_slice %252 {offsets = [0, 0], sizes = [8, 32], strides = [1, 1]} : vector<8x96xf32> to vector<8x32xf32>
    %256 = vector.extract_strided_slice %252 {offsets = [0, 32], sizes = [8, 32], strides = [1, 1]} : vector<8x96xf32> to vector<8x32xf32>
    %257 = vector.extract_strided_slice %252 {offsets = [0, 64], sizes = [8, 32], strides = [1, 1]} : vector<8x96xf32> to vector<8x32xf32>
    %258 = arith.mulf %256, %221 : vector<8x32xf32>
    %259 = arith.mulf %255, %254 : vector<8x32xf32>
    %260 = arith.addf %258, %259 : vector<8x32xf32>
    %261 = math.tanh %260 : vector<8x32xf32>
    %262 = arith.mulf %257, %261 : vector<8x32xf32>
    %263 = vector.extract_strided_slice %8 {offsets = [56, 0], sizes = [8, 128], strides = [1, 1]} : vector<64x128xf32> to vector<8x128xf32>
    %cst_34 = arith.constant dense<0.000000e+00> : vector<8x128xf32>
    %264 = tpu.matmul %246, %1, %cst_34 {dimension_numbers = #tpu.dot_dimension_numbers<[1], [0], [0], [1], [0, 0, 1, 1], [], []>} : vector<8x32xf32>, vector<32x128xf32>, vector<8x128xf32> -> vector<8x128xf32>
    %265 = arith.addf %263, %264 : vector<8x128xf32>
    %266 = tpu.concatenate %246, %262 in 1 : vector<8x32xf32>, vector<8x32xf32> -> vector<8x64xf32>
    %cst_35 = arith.constant dense<0.000000e+00> : vector<8x128xf32>
    %267 = tpu.matmul %266, %2, %cst_35 {dimension_numbers = #tpu.dot_dimension_numbers<[1], [0], [0], [1], [0, 0, 1, 1], [], []>} : vector<8x64xf32>, vector<64x128xf32>, vector<8x128xf32> -> vector<8x128xf32>
    %268 = vector.broadcast %4 : vector<1x128xf32> to vector<8x128xf32>
    %269 = arith.addf %267, %268 : vector<8x128xf32>
    %270 = vector.extract_strided_slice %265 {offsets = [0, 0], sizes = [8, 96], strides = [1, 1]} : vector<8x128xf32> to vector<8x96xf32>
    %271 = arith.negf %270 : vector<8x96xf32>
    %272 = math.exp %271 : vector<8x96xf32>
    %cst_36 = arith.constant 1.000000e+00 : f32
    %273 = vector.broadcast %cst_36 : f32 to vector<8x96xf32>
    %274 = arith.addf %273, %272 : vector<8x96xf32>
    %275 = arith.divf %273, %274 : vector<8x96xf32>
    %276 = vector.extract_strided_slice %265 {offsets = [0, 96], sizes = [8, 32], strides = [1, 1]} : vector<8x128xf32> to vector<8x32xf32>
    %277 = math.tanh %276 : vector<8x32xf32>
    %278 = vector.extract_strided_slice %275 {offsets = [0, 0], sizes = [8, 32], strides = [1, 1]} : vector<8x96xf32> to vector<8x32xf32>
    %279 = vector.extract_strided_slice %275 {offsets = [0, 32], sizes = [8, 32], strides = [1, 1]} : vector<8x96xf32> to vector<8x32xf32>
    %280 = vector.extract_strided_slice %275 {offsets = [0, 64], sizes = [8, 32], strides = [1, 1]} : vector<8x96xf32> to vector<8x32xf32>
    %281 = arith.mulf %279, %244 : vector<8x32xf32>
    %282 = arith.mulf %278, %277 : vector<8x32xf32>
    %283 = arith.addf %281, %282 : vector<8x32xf32>
    %284 = math.tanh %283 : vector<8x32xf32>
    %285 = arith.mulf %280, %284 : vector<8x32xf32>
    %286 = vector.extract_strided_slice %269 {offsets = [0, 0], sizes = [8, 96], strides = [1, 1]} : vector<8x128xf32> to vector<8x96xf32>
    %287 = arith.negf %286 : vector<8x96xf32>
    %288 = math.exp %287 : vector<8x96xf32>
    %cst_37 = arith.constant 1.000000e+00 : f32
    %289 = vector.broadcast %cst_37 : f32 to vector<8x96xf32>
    %290 = arith.addf %289, %288 : vector<8x96xf32>
    %291 = arith.divf %289, %290 : vector<8x96xf32>
    %292 = vector.extract_strided_slice %269 {offsets = [0, 96], sizes = [8, 32], strides = [1, 1]} : vector<8x128xf32> to vector<8x32xf32>
    %293 = math.tanh %292 : vector<8x32xf32>
    %294 = vector.extract_strided_slice %291 {offsets = [0, 0], sizes = [8, 32], strides = [1, 1]} : vector<8x96xf32> to vector<8x32xf32>
    %295 = vector.extract_strided_slice %291 {offsets = [0, 32], sizes = [8, 32], strides = [1, 1]} : vector<8x96xf32> to vector<8x32xf32>
    %296 = vector.extract_strided_slice %291 {offsets = [0, 64], sizes = [8, 32], strides = [1, 1]} : vector<8x96xf32> to vector<8x32xf32>
    %297 = arith.mulf %295, %260 : vector<8x32xf32>
    %298 = arith.mulf %294, %293 : vector<8x32xf32>
    %299 = arith.addf %297, %298 : vector<8x32xf32>
    %300 = math.tanh %299 : vector<8x32xf32>
    %301 = arith.mulf %296, %300 : vector<8x32xf32>
    %302 = tpu.concatenate %285, %301 in 1 : vector<8x32xf32>, vector<8x32xf32> -> vector<8x64xf32>
    %cst_38 = arith.constant dense<0.000000e+00> : vector<8x128xf32>
    %303 = tpu.matmul %302, %2, %cst_38 {dimension_numbers = #tpu.dot_dimension_numbers<[1], [0], [0], [1], [0, 0, 1, 1], [], []>} : vector<8x64xf32>, vector<64x128xf32>, vector<8x128xf32> -> vector<8x128xf32>
    %304 = vector.broadcast %4 : vector<1x128xf32> to vector<8x128xf32>
    %305 = arith.addf %303, %304 : vector<8x128xf32>
    %306 = vector.extract_strided_slice %305 {offsets = [0, 0], sizes = [8, 96], strides = [1, 1]} : vector<8x128xf32> to vector<8x96xf32>
    %307 = arith.negf %306 : vector<8x96xf32>
    %308 = math.exp %307 : vector<8x96xf32>
    %cst_39 = arith.constant 1.000000e+00 : f32
    %309 = vector.broadcast %cst_39 : f32 to vector<8x96xf32>
    %310 = arith.addf %309, %308 : vector<8x96xf32>
    %311 = arith.divf %309, %310 : vector<8x96xf32>
    %312 = vector.extract_strided_slice %305 {offsets = [0, 96], sizes = [8, 32], strides = [1, 1]} : vector<8x128xf32> to vector<8x32xf32>
    %313 = math.tanh %312 : vector<8x32xf32>
    %314 = vector.extract_strided_slice %311 {offsets = [0, 0], sizes = [8, 32], strides = [1, 1]} : vector<8x96xf32> to vector<8x32xf32>
    %315 = vector.extract_strided_slice %311 {offsets = [0, 32], sizes = [8, 32], strides = [1, 1]} : vector<8x96xf32> to vector<8x32xf32>
    %316 = vector.extract_strided_slice %311 {offsets = [0, 64], sizes = [8, 32], strides = [1, 1]} : vector<8x96xf32> to vector<8x32xf32>
    %317 = arith.mulf %315, %299 : vector<8x32xf32>
    %318 = arith.mulf %314, %313 : vector<8x32xf32>
    %319 = arith.addf %317, %318 : vector<8x32xf32>
    %320 = math.tanh %319 : vector<8x32xf32>
    %321 = arith.mulf %316, %320 : vector<8x32xf32>
    %c0_40 = arith.constant 0 : index
    %c0_41 = arith.constant 0 : index
    %322 = vector.load %arg2[%c0_40, %c0_41] : memref<48x32xf32, #tpu.memory_space<vmem>>, vector<8x32xf32>
    %c8 = arith.constant 8 : index
    %c0_42 = arith.constant 0 : index
    %323 = vector.load %arg2[%c8, %c0_42] : memref<48x32xf32, #tpu.memory_space<vmem>>, vector<32x32xf32>
    %c40 = arith.constant 40 : index
    %c0_43 = arith.constant 0 : index
    %324 = vector.load %arg2[%c40, %c0_43] : memref<48x32xf32, #tpu.memory_space<vmem>>, vector<1x32xf32>
    %c41 = arith.constant 41 : index
    %c0_44 = arith.constant 0 : index
    %325 = vector.load %arg2[%c41, %c0_44] : memref<48x32xf32, #tpu.memory_space<vmem>>, vector<1x32xf32>
    %c42 = arith.constant 42 : index
    %c0_45 = arith.constant 0 : index
    %326 = vector.load %arg2[%c42, %c0_45] : memref<48x32xf32, #tpu.memory_space<vmem>>, vector<1x32xf32>
    %c43 = arith.constant 43 : index
    %c0_46 = arith.constant 0 : index
    %327 = vector.load %arg2[%c43, %c0_46] : memref<48x32xf32, #tpu.memory_space<vmem>>, vector<1x1xf32>
    %328 = arith.mulf %321, %322 : vector<8x32xf32>
    %cst_47 = arith.constant dense<0.000000e+00> : vector<32xf32>
    %329 = vector.multi_reduction <add>, %328, %cst_47 [0] : vector<8x32xf32> to vector<32xf32>
    %330 = vector.shape_cast %329 : vector<32xf32> to vector<1x32xf32>
    %331 = arith.addf %330, %326 : vector<1x32xf32>
    %cst_48 = arith.constant 0.000000e+00 : f32
    %332 = vector.broadcast %cst_48 : f32 to vector<1x32xf32>
    %333 = arith.cmpf oge, %331, %332 : vector<1x32xf32>
    %cst_49 = arith.constant 2.000000e-01 : f32
    %334 = vector.broadcast %cst_49 : f32 to vector<1x32xf32>
    %335 = arith.mulf %334, %331 : vector<1x32xf32>
    %336 = arith.select %333, %331, %335 : vector<1x32xi1>, vector<1x32xf32>
    %337 = vector.broadcast %336 : vector<1x32xf32> to vector<32x32xf32>
    %338 = arith.addf %337, %323 : vector<32x32xf32>
    %cst_50 = arith.constant dense<0xFF800000> : vector<32xf32>
    %339 = vector.multi_reduction <maximumf>, %338, %cst_50 [1] : vector<32x32xf32> to vector<32xf32>
    %340 = vector.shape_cast %339 : vector<32xf32> to vector<32x1xf32>
    %341 = vector.broadcast %340 : vector<32x1xf32> to vector<32x32xf32>
    %342 = arith.subf %338, %341 : vector<32x32xf32>
    %343 = math.exp %342 : vector<32x32xf32>
    %cst_51 = arith.constant dense<0.000000e+00> : vector<32xf32>
    %344 = vector.multi_reduction <add>, %343, %cst_51 [1] : vector<32x32xf32> to vector<32xf32>
    %345 = vector.shape_cast %344 : vector<32xf32> to vector<32x1xf32>
    %346 = tpu.reciprocal %345 {approx = true} : vector<32x1xf32> -> vector<32x1xf32>
    %347 = vector.broadcast %346 : vector<32x1xf32> to vector<32x32xf32>
    %348 = arith.mulf %343, %347 : vector<32x32xf32>
    %cst_52 = arith.constant dense<0.000000e+00> : vector<8x32xf32>
    %349 = tpu.matmul %321, %348, %cst_52 {dimension_numbers = #tpu.dot_dimension_numbers<[1], [0], [0], [1], [0, 0, 1, 1], [], []>} : vector<8x32xf32>, vector<32x32xf32>, vector<8x32xf32> -> vector<8x32xf32>
    %350 = vector.broadcast %324 : vector<1x32xf32> to vector<8x32xf32>
    %351 = arith.mulf %321, %350 : vector<8x32xf32>
    %352 = vector.broadcast %325 : vector<1x32xf32> to vector<8x32xf32>
    %353 = arith.mulf %349, %352 : vector<8x32xf32>
    %354 = arith.addf %351, %353 : vector<8x32xf32>
    %cst_53 = arith.constant dense<0.000000e+00> : vector<8xf32>
    %355 = vector.multi_reduction <add>, %354, %cst_53 [1] : vector<8x32xf32> to vector<8xf32>
    %356 = vector.shape_cast %355 : vector<8xf32> to vector<8x1xf32>
    %357 = vector.broadcast %327 : vector<1x1xf32> to vector<8x1xf32>
    %358 = arith.addf %356, %357 : vector<8x1xf32>
    %c0_54 = arith.constant 0 : index
    %c0_55 = arith.constant 0 : index
    %359 = vector.load %arg3[%c0_54, %c0_55] : memref<8x1xf32, #tpu.memory_space<vmem>>, vector<8x1xf32>
    tpu.vector_store %arg3[%c0_54, %c0_55], %358 {strides = array<i32>} : memref<8x1xf32, #tpu.memory_space<vmem>>, vector<8x1xf32>,
    return
  }
}

</mosaic_0001>

<bundles_post_ra>
// kernel: talstm_forward.1
= control target key start
LH: loop header
LB: loop body
LE: loop exit
PB: predicated region body
PF: predicated region fallthrough
CT: control target
= control target key end

     0   :  { %vm42_vm0 = vcmask 130048   ;;  %v2794_v0 = vmov 0.0|0.0   ;;  %vm2795_vm1 = vmmov 0   ;;  %v2796_v4 = vmov 0.0   ;;  %s2797_s30 = smov 32   ;;  %s3274_s1 = inlined_call_operand.vmem [shape: f32[120,128], index: 1, kind: input, shape index: {}]   ;;  %s3275_s0 = inlined_call_operand.vmem [shape: f32[64,16], index: 0, kind: input, shape index: {}]   ;;  %s3276_s2 = inlined_call_operand.vmem [shape: f32[48,32], index: 2, kind: input, shape index: {}]   ;;  %s3277_s3 = inlined_call_operand.vmem [shape: f32[8,1], index: 3, kind: output, shape index: {}]  }
   0x1   :  { %2484 = vmatprep.subr.bf16.mxu1 %v2794_v0  ;;  %v14_v1 = vld [vmem:[%s3274_s1] sm:$0xff]  ;;  %v15_v2 = vld [vmem:[%s3274_s1 + $0x8] sm:$0xff]  ;;  %v16_v3 = vld [vmem:[%s3274_s1 + $0x10] sm:$0xff]  ;;  %2237 = vmatprep.mubr.msk.f32.mxu1 %vm2795_vm1, %v2796_v4  ;;  %vm172_vm2 = vcmask 261120   ;;  %vm353_vm3 = vcmask 523264   ;;  %vm1813_vm4 = vcmask 785920  }
   0x2   :  { %v2480_v5 = vpack.c.bf16 %v15_v2, %v14_v1  ;;  %v17_v6 = vld [vmem:[%s3274_s1 + $0x18] sm:$0xff]  ;;  %v30_v7 = vld [vmem:[%s3275_s0] sm:$0xff]  ;;  %v19_v10 = vld [vmem:[%s3274_s1 + $0x28] sm:$0xff]  ;;  %vm2035_vm6 = vcmask 7168  }
   0x3   :  { %v2838_v8 = vpack.c.bf16 %v17_v6, %v16_v3  ;;  %2217 = vmatprep.mubr.msk.f32.mxu0 %vm42_vm0, %v30_v7  ;;  %v18_v9 = vld [vmem:[%s3274_s1 + $0x20] sm:$0xff]  ;;  %v31_v11 = vld [vmem:[%s3275_s0 + $0x8] sm:$0xff]  ;;  %v2868_v13 = vld [vmem:[%s3274_s1 + $0x70] ss:$0 sm:$0xff] }
   0x4   :  { %2481 = vmatprep.subr.bf16.mxu0 %v2480_v5  ;;  %v2851_v12 = vpack.c.bf16 %v19_v10, %v18_v9  ;;  %v20_v30 = vld [vmem:[%s3274_s1 + $0x30] sm:$0xff]  ;;  %v21_v31 = vld [vmem:[%s3274_s1 + $0x38] sm:$0xff]  ;;  %v22_v35 = vld [vmem:[%s3274_s1 + $0x40] sm:$0xff] }
   0x5   :  { %2486 = vmatpush3.bf16.msra.mxu1 %v2838_v8  ;;  %2483 = vmatpush3.bf16.msra.mxu0 %v2480_v5  ;;  %v32_v32 = vld [vmem:[%s3275_s0 + $0x10] sm:$0xff]  ;;  %v2887_v33 = vpack.c.bf16 %v21_v31, %v20_v30  ;;  %v33_v34 = vld [vmem:[%s3275_s0 + $0x18] sm:$0xff]  ;;  %v23_v36 = vld [vmem:[%s3274_s1 + $0x48] sm:$0xff] }
   0x6   :  { %2487 = vmatprep.subr.bf16.mxu1 %v2794_v0  ;;  %2496 = vmatprep.subr.bf16.mxu0 %v2794_v0  ;;  %v34_v37 = vld [vmem:[%s3275_s0 + $0x20] sm:$0xff]  ;;  %v2904_v38 = vpack.c.bf16 %v23_v36, %v22_v35  ;;  %v35_v39 = vld [vmem:[%s3275_s0 + $0x28] sm:$0xff]  ;;  %v24_v40 = vld [vmem:[%s3274_s1 + $0x50] sm:$0xff] }
   0x7   :  { %v25_v41 = vld [vmem:[%s3274_s1 + $0x58] sm:$0xff]  ;;  %v36_v42 = vld [vmem:[%s3275_s0 + $0x30] sm:$0xff]  ;;  %v26_v45 = vld [vmem:[%s3274_s1 + $0x60] sm:$0xff] }
   0x8   :  { %2218 = vmatmul.mubr.msk.f32.vlgmr.msra.gmra.mrb[0].mxu0 %vm42_vm0, %v31_v11  ;;  %v2922_v43 = vpack.c.bf16 %v25_v41, %v24_v40  ;;  %v37_v44 = vld [vmem:[%s3275_s0 + $0x38] sm:$0xff]  ;;  %v27_v46 = vld [vmem:[%s3274_s1 + $0x68] sm:$0xff]  ;;  %s2798_s0 = smov 64   ;;  %v2982_v60 = vld [vmem:[%s3274_s1 + $0x71] ss:$0 sm:$0xff]  ;;  %s2799_s1 = smov 96  }
   0x9   :  { %2489 = vmatpush3.bf16.msra.mxu1 %v2851_v12  ;;  %2220 = vmatprep.mubr.msk.f32.mxu0 %vm42_vm0, %v32_v32  ;;  %v2938_v48 = vpack.c.bf16 %v27_v46, %v26_v45 }
   0xa   :  { %2490 = vmatprep.subr.bf16.mxu1 %v2794_v0  ;;  %2498 = vmatpush3.bf16.msra.mxu0 %v2887_v33 }
   0xb   :  { %2499 = vmatprep.subr.bf16.mxu0 %v2794_v0 }
   0xc   :  { %2238 = vmatmul.mubr.f32.vlgmr.msra.gmra.mrb[0].mxu1 %v2796_v4  ;;  %2221 = vmatmul.mubr.msk.f32.gmra.mrb[2].mxu0 %vm42_vm0, %v33_v34 }
   0xd   :  { %2492 = vmatpush3.bf16.msra.mxu1 %v2838_v8  ;;  %2248 = vmatprep.mubr.msk.f32.mxu1 %vm2795_vm1, %v2796_v4 }
   0xe   :  { %2493 = vmatprep.subr.bf16.mxu1 %v2794_v0  ;;  %2223 = vmatprep.mubr.msk.f32.mxu0 %vm42_vm0, %v34_v37 }
   0xf   :  { %2501 = vmatpush3.bf16.msra.mxu0 %v2904_v38 }
  0x10   :  { %2224 = vmatmul.mubr.msk.f32.gmra.mrb[4].mxu0 %vm42_vm0, %v35_v39  ;;  %2502 = vmatprep.subr.bf16.mxu0 %v2794_v0 }
  0x11   :  { %2495 = vmatpush3.bf16.msra.mxu1 %v2851_v12  ;;  %2226 = vmatprep.mubr.msk.f32.mxu0 %vm42_vm0, %v36_v42 }
  0x12   :  { %2508 = vmatprep.subr.bf16.mxu1 %v2794_v0 }
  0x13   :  { %2504 = vmatpush3.bf16.msra.mxu0 %v2922_v43 }
  0x14   :  { %2227 = vmatmul.mubr.msk.f32.gmra.mrb[6].mxu0 %vm42_vm0, %v37_v44  ;;  %2505 = vmatprep.subr.bf16.mxu0 %v2794_v0 }
  0x15   :  { %2267 = vmatprep.mubr.msk.f32.mxu0 %vm2795_vm1, %v2796_v4 }
  0x17   :  { %2507 = vmatpush3.bf16.msra.mxu0 %v2938_v48 }
  0x18   :  { %2514 = vmatprep.subr.bf16.mxu0 %v2794_v0 }
  0xdb   :  { %v2870_v14 = vpop.f32.mrb[0].mxu0 }
  0xdc   :  { %v133_v15 = vpop.f32.mrb[1].mxu0  ;;  %v139_v59 = vadd.f32 %v2870_v14, %v2868_v13 }
  0xdd   :  { %v134_v16 = vadd.f32 %v2868_v13, %v133_v15 }
  0xdf   :  { %v242_v17 = vpop.f32.mrb[0].mxu1  ;;  %v2946_v51 = vpop.f32.mrb[2].mxu0 }
  0xe0   :  { %v246_v18 = vadd.f32 %v242_v17, %v134_v16  ;;  %v2239_v19 = vpop.f32.mrb[1].mxu1  ;;  %v2948_v52 = vpop.f32.mrb[3].mxu0 }
  0xe1   :  { %v144_v39 = vadd.f32 %v2868_v13, %v2948_v52 }
  0xe2   :  { %2650 = vtanh.f32 %v246_v18  ;;  %v2050_v21 = vmul.f32 -1.442695, %v246_v18 }
  0xe3   :  { %v2950_v53 = vpop.f32.mrb[4].mxu0 }
  0xe4   :  { %2652 = vpow2.f32 %v2050_v21  ;;  %v2952_v54 = vpop.f32.mrb[5].mxu0 }
  0xe7   :  { %v2954_v55 = vpop.f32.mrb[6].mxu0 }
  0xe8   :  { %v2956_v56 = vpop.f32.mrb[7].mxu0 }
  0xec   :  { %v2651_v20 = vpop.eup %2650 }
  0xed   :  { %256 = vrot.lane.b32.xlu0 %v2651_v20, %s2797_s30 }
  0xee   :  { %v2653_v22 = vpop.eup %2652 }
  0xef   :  { %v250_v23 = vadd.f32 1.0, %v2653_v22 }
  0xf1   :  { %2654 = vrcp.f32 %v250_v23 }
  0xfb   :  { %v2655_v24 = vpop.eup %2654 }
  0xfc   :  { %v254_v27 = vmul.f32 0.0, %v2655_v24 }
 0x15f   :  { %v257_v25 = vpop.permute.xlu0 %256 }
 0x160   :  { %v259_v26 = vmul.f32 %v2655_v24, %v257_v25 }
 0x162   :  { %261 = vrot.lane.b32.xlu0 %v259_v26, %s2797_s30 }
 0x1d4   :  { %v262_v28 = vpop.permute.xlu0 %261 }
 0x1d5   :  { %v2875_v29 = vadd.f32 %v262_v28, %v254_v27 }
 0x1d7   :  { %2656 = vtanh.f32 %v2875_v29 }
 0x1e1   :  { %v2657_v47 = vpop.eup %2656 }
 0x1e2   :  { %267 = vrot.lane.b32.xlu1 %v2657_v47, %s2797_s30 }
 0x254   :  { %v268_v49 = vpop.permute.xlu1 %267 }
 0x255   :  { %v270_v50 = vmul.f32 %v2655_v24, %v268_v49 }
 0x257   :  { %272 = vrot.lane.b32.xlu1 %v270_v50, %s2798_s0 }
 0x2c9   :  { %v273_v57 = vpop.permute.xlu1 %272 }
 0x2ca   :  { %v348_v58 = vsel %vm172_vm2, %v273_v57, 0.0  ;;  %2249 = vmatmul.mubr.msk.f32.vlgmr.msra.gmra.mrb[2].mxu1 %vm172_vm2, %v273_v57 }
 0x2cb   :  { %2268 = vmatmul.mubr.msk.f32.vlgmr.msra.gmra.mrb[8].mxu0 %vm353_vm3, %v348_v58  ;;  %2510 = vmatpush3.bf16.msra.mxu1 %v2838_v8 }
 0x2cc   :  { %2516 = vmatpush3.bf16.msra.mxu0 %v2887_v33  ;;  %2511 = vmatprep.subr.bf16.mxu1 %v2794_v0 }
 0x2cd   :  { %2517 = vmatprep.subr.bf16.mxu0 %v2794_v0  ;;  %2278 = vmatprep.mubr.msk.f32.mxu1 %vm2795_vm1, %v2796_v4 }
 0x2ce   :  { %2297 = vmatprep.mubr.msk.f32.mxu0 %vm2795_vm1, %v2796_v4 }
 0x2cf   :  { %2513 = vmatpush3.bf16.msra.mxu1 %v2851_v12 }
 0x2d0   :  { %2519 = vmatpush3.bf16.msra.mxu0 %v2904_v38  ;;  %2526 = vmatprep.subr.bf16.mxu1 %v2794_v0 }
 0x2d1   :  { %2520 = vmatprep.subr.bf16.mxu0 %v2794_v0 }
 0x2d4   :  { %2522 = vmatpush3.bf16.msra.mxu0 %v2922_v43 }
 0x2d5   :  { %2523 = vmatprep.subr.bf16.mxu0 %v2794_v0 }
 0x2d8   :  { %2525 = vmatpush3.bf16.msra.mxu0 %v2938_v48 }
 0x2d9   :  { %2544 = vmatprep.subr.bf16.mxu0 %v2794_v0 }
 0x39d   :  { %v342_v61 = vpop.f32.mrb[2].mxu1 }
 0x39e   :  { %v346_v62 = vadd.f32 %v342_v61, %v139_v59  ;;  %v2250_v63 = vpop.f32.mrb[3].mxu1  ;;  %v423_v1 = vpop.f32.mrb[8].mxu0 }
 0x39f   :  { %v424_v2 = vadd.f32 %v2982_v60, %v423_v1  ;;  %v2269_v3 = vpop.f32.mrb[9].mxu0 }
 0x3a0   :  { %2658 = vtanh.f32 %v346_v62  ;;  %v2054_v7 = vmul.f32 -1.442695, %v346_v62 }
 0x3a1   :  { %2660 = vtanh.f32 %v424_v2  ;;  %v2055_v9 = vmul.f32 -1.442695, %v424_v2 }
 0x3a2   :  { %2662 = vpow2.f32 %v2054_v7 }
 0x3a3   :  { %2664 = vpow2.f32 %v2055_v9 }
 0x3aa   :  { %v2659_v5 = vpop.eup %2658 }
 0x3ab   :  { %v2661_v6 = vpop.eup %2660  ;;  %436 = vrot.lane.b32.xlu0 %v2659_v5, %s2797_s30 }
 0x3ac   :  { %460 = vrot.lane.b32.xlu1 %v2661_v6, %s2797_s30  ;;  %v2663_v10 = vpop.eup %2662 }
 0x3ad   :  { %v2665_v11 = vpop.eup %2664  ;;  %v430_v14 = vadd.f32 1.0, %v2663_v10 }
 0x3ae   :  { %v454_v15 = vadd.f32 1.0, %v2665_v11 }
 0x3af   :  { %2666 = vrcp.f32 %v430_v14 }
 0x3b0   :  { %2668 = vrcp.f32 %v454_v15 }
 0x3b9   :  { %v2667_v16 = vpop.eup %2666 }
 0x3ba   :  { %v2669_v18 = vpop.eup %2668  ;;  %v434_v22 = vmul.f32 %v2667_v16, %v2875_v29 }
 0x3bb   :  { %v458_v24 = vmul.f32 0.0, %v2669_v18 }
 0x41d   :  { %v437_v17 = vpop.permute.xlu0 %436 }
 0x41e   :  { %v439_v19 = vmul.f32 %v2667_v16, %v437_v17  ;;  %v461_v20 = vpop.permute.xlu1 %460 }
 0x41f   :  { %v463_v21 = vmul.f32 %v2669_v18, %v461_v20 }
 0x420   :  { %441 = vrot.lane.b32.xlu0 %v439_v19, %s2797_s30 }
 0x421   :  { %465 = vrot.lane.b32.xlu1 %v463_v21, %s2797_s30 }
 0x492   :  { %v442_v23 = vpop.permute.xlu0 %441 }
 0x493   :  { %v444_v25 = vadd.f32 %v442_v23, %v434_v22  ;;  %v466_v26 = vpop.permute.xlu1 %465 }
 0x494   :  { %v2990_v27 = vadd.f32 %v466_v26, %v458_v24  ;;  %v149_v24 = vadd.f32 %v2946_v51, %v2868_v13 }
 0x495   :  { %2670 = vtanh.f32 %v444_v25 }
 0x496   :  { %2672 = vtanh.f32 %v2990_v27 }
 0x49f   :  { %v2671_v28 = vpop.eup %2670 }
 0x4a0   :  { %v2673_v30 = vpop.eup %2672  ;;  %447 = vrot.lane.b32.xlu0 %v2671_v28, %s2797_s30 }
 0x4a1   :  { %471 = vrot.lane.b32.xlu1 %v2673_v30, %s2797_s30 }
 0x512   :  { %v448_v31 = vpop.permute.xlu0 %447 }
 0x513   :  { %v450_v32 = vmul.f32 %v2667_v16, %v448_v31  ;;  %v472_v34 = vpop.permute.xlu1 %471 }
 0x514   :  { %v474_v35 = vmul.f32 %v2669_v18, %v472_v34 }
 0x515   :  { %476 = vrot.lane.b32.xlu0 %v450_v32, %s2798_s0 }
 0x516   :  { %553 = vrot.lane.b32.xlu1 %v474_v35, %s2799_s1 }
 0x587   :  { %v477_v29 = vpop.permute.xlu0 %476 }
 0x588   :  { %2279 = vmatmul.mubr.msk.f32.vlgmr.msra.gmra.mrb[4].mxu1 %vm172_vm2, %v477_v29  ;;  %v554_v36 = vpop.permute.xlu1 %553 }
 0x589   :  { %v556_v37 = vsel %vm172_vm2, %v477_v29, %v554_v36  ;;  %2528 = vmatpush3.bf16.msra.mxu1 %v2838_v8  ;;  %2308 = vmatprep.mubr.msk.f32.mxu1 %vm2795_vm1, %v2796_v4 }
 0x58a   :  { %2298 = vmatmul.mubr.msk.f32.vlgmr.msra.gmra.mrb[10].mxu0 %vm353_vm3, %v556_v37  ;;  %2529 = vmatprep.subr.bf16.mxu1 %v2794_v0 }
 0x58b   :  { %2546 = vmatpush3.bf16.msra.mxu0 %v2838_v8  ;;  %2338 = vmatprep.mubr.msk.f32.mxu0 %vm2795_vm1, %v2796_v4 }
 0x58c   :  { %2547 = vmatprep.subr.bf16.mxu0 %v2794_v0 }
 0x58d   :  { %2531 = vmatpush3.bf16.msra.mxu1 %v2851_v12 }
 0x58e   :  { %2532 = vmatprep.subr.bf16.mxu1 %v2794_v0 }
 0x58f   :  { %2549 = vmatpush3.bf16.msra.mxu0 %v2851_v12 }
 0x590   :  { %2550 = vmatprep.subr.bf16.mxu0 %v2794_v0 }
 0x65b   :  { %v546_v40 = vpop.f32.mrb[4].mxu1 }
 0x65c   :  { %v550_v41 = vadd.f32 %v546_v40, %v144_v39  ;;  %v2280_v42 = vpop.f32.mrb[5].mxu1 }
 0x65d   :  { %v626_v44 = vpop.f32.mrb[10].mxu0 }
 0x65e   :  { %2674 = vtanh.f32 %v550_v41  ;;  %v627_v45 = vadd.f32 %v2982_v60, %v626_v44  ;;  %v2299_v46 = vpop.f32.mrb[11].mxu0  ;;  %v2058_v50 = vmul.f32 -1.442695, %v550_v41 }
 0x660   :  { %2676 = vtanh.f32 %v627_v45  ;;  %v2059_v57 = vmul.f32 -1.442695, %v627_v45 }
 0x661   :  { %2678 = vpow2.f32 %v2058_v50 }
 0x662   :  { %2680 = vpow2.f32 %v2059_v57 }
 0x668   :  { %v2675_v47 = vpop.eup %2674 }
 0x669   :  { %639 = vrot.lane.b32.xlu0 %v2675_v47, %s2797_s30 }
 0x66a   :  { %v2677_v49 = vpop.eup %2676 }
 0x66b   :  { %663 = vrot.lane.b32.xlu1 %v2677_v49, %s2797_s30  ;;  %v2679_v52 = vpop.eup %2678 }
 0x66c   :  { %v2681_v58 = vpop.eup %2680  ;;  %v633_v59 = vadd.f32 1.0, %v2679_v52 }
 0x66d   :  { %v657_v61 = vadd.f32 1.0, %v2681_v58 }
 0x66e   :  { %2682 = vrcp.f32 %v633_v59 }
 0x66f   :  { %2684 = vrcp.f32 %v657_v61 }
 0x678   :  { %v2683_v62 = vpop.eup %2682 }
 0x679   :  { %v2685_v2 = vpop.eup %2684  ;;  %v637_v6 = vmul.f32 %v2683_v62, %v444_v25 }
 0x67a   :  { %v661_v10 = vmul.f32 %v2685_v2, %v2990_v27 }
 0x6db   :  { %v640_v63 = vpop.permute.xlu0 %639 }
 0x6dc   :  { %v642_v1 = vmul.f32 %v2683_v62, %v640_v63 }
 0x6dd   :  { %v664_v3 = vpop.permute.xlu1 %663 }
 0x6de   :  { %644 = vrot.lane.b32.xlu0 %v642_v1, %s2797_s30  ;;  %v666_v5 = vmul.f32 %v2685_v2, %v664_v3 }
 0x6e0   :  { %668 = vrot.lane.b32.xlu1 %v666_v5, %s2797_s30 }
 0x750   :  { %v645_v7 = vpop.permute.xlu0 %644 }
 0x751   :  { %v3019_v9 = vadd.f32 %v645_v7, %v637_v6  ;;  %v154_v7 = vadd.f32 %v2868_v13, %v2952_v54 }
 0x752   :  { %v669_v11 = vpop.permute.xlu1 %668 }
 0x753   :  { %2686 = vtanh.f32 %v3019_v9  ;;  %v3023_v14 = vadd.f32 %v669_v11, %v661_v10 }
 0x755   :  { %2688 = vtanh.f32 %v3023_v14 }
 0x75d   :  { %v2687_v15 = vpop.eup %2686 }
 0x75e   :  { %650 = vrot.lane.b32.xlu0 %v2687_v15, %s2797_s30 }
 0x75f   :  { %v2689_v16 = vpop.eup %2688 }
 0x760   :  { %674 = vrot.lane.b32.xlu1 %v2689_v16, %s2797_s30 }
 0x7d0   :  { %v651_v17 = vpop.permute.xlu0 %650 }
 0x7d1   :  { %v653_v18 = vmul.f32 %v2683_v62, %v651_v17 }
 0x7d2   :  { %v675_v19 = vpop.permute.xlu1 %674 }
 0x7d3   :  { %679 = vrot.lane.b32.xlu0 %v653_v18, %s2798_s0  ;;  %v677_v20 = vmul.f32 %v2685_v2, %v675_v19 }
 0x7d5   :  { %756 = vrot.lane.b32.xlu1 %v677_v20, %s2799_s1 }
 0x845   :  { %v680_v21 = vpop.permute.xlu0 %679 }
 0x846   :  { %2309 = vmatmul.mubr.msk.f32.vlgmr.msra.gmra.mrb[6].mxu1 %vm172_vm2, %v680_v21 }
 0x847   :  { %2534 = vmatpush3.bf16.msra.mxu1 %v2887_v33  ;;  %2327 = vmatprep.mubr.msk.f32.mxu1 %vm2795_vm1, %v2796_v4  ;;  %v757_v22 = vpop.permute.xlu1 %756 }
 0x848   :  { %2535 = vmatprep.subr.bf16.mxu1 %v2794_v0  ;;  %v759_v23 = vsel %vm172_vm2, %v680_v21, %v757_v22 }
 0x84b   :  { %2537 = vmatpush3.bf16.msra.mxu1 %v2904_v38 }
 0x84c   :  { %2538 = vmatprep.subr.bf16.mxu1 %v2794_v0 }
 0x84f   :  { %2540 = vmatpush3.bf16.msra.mxu1 %v2922_v43 }
 0x850   :  { %2541 = vmatprep.subr.bf16.mxu1 %v2794_v0 }
 0x853   :  { %2543 = vmatpush3.bf16.msra.mxu1 %v2938_v48 }
 0x854   :  { %2562 = vmatprep.subr.bf16.mxu1 %v2794_v0 }
 0x856   :  { %2328 = vmatmul.mubr.msk.f32.vlgmr.msra.gmra.mrb[8].mxu1 %vm353_vm3, %v759_v23 }
 0x857   :  { %2564 = vmatpush3.bf16.msra.mxu1 %v2838_v8  ;;  %2368 = vmatprep.mubr.msk.f32.mxu1 %vm2795_vm1, %v2796_v4 }
 0x858   :  { %2565 = vmatprep.subr.bf16.mxu1 %v2794_v0 }
 0x85b   :  { %2567 = vmatpush3.bf16.msra.mxu1 %v2851_v12 }
 0x85c   :  { %2568 = vmatprep.subr.bf16.mxu1 %v2794_v0 }
 0x919   :  { %v749_v25 = vpop.f32.mrb[6].mxu1 }
 0x91a   :  { %v753_v26 = vadd.f32 %v749_v25, %v149_v24  ;;  %v2310_v27 = vpop.f32.mrb[7].mxu1 }
 0x91c   :  { %2690 = vtanh.f32 %v753_v26  ;;  %v2062_v35 = vmul.f32 -1.442695, %v753_v26 }
 0x926   :  { %v2691_v28 = vpop.eup %2690 }
 0x927   :  { %842 = vrot.lane.b32.xlu0 %v2691_v28, %s2797_s30 }
 0x929   :  { %v829_v30 = vpop.f32.mrb[8].mxu1 }
 0x92a   :  { %v830_v31 = vadd.f32 %v2982_v60, %v829_v30  ;;  %v2329_v32 = vpop.f32.mrb[9].mxu1 }
 0x92c   :  { %2692 = vtanh.f32 %v830_v31  ;;  %v2063_v36 = vmul.f32 -1.442695, %v830_v31 }
 0x92d   :  { %2694 = vpow2.f32 %v2062_v35 }
 0x92e   :  { %2696 = vpow2.f32 %v2063_v36 }
 0x936   :  { %v2693_v34 = vpop.eup %2692 }
 0x937   :  { %866 = vrot.lane.b32.xlu1 %v2693_v34, %s2797_s30  ;;  %v2695_v29 = vpop.eup %2694 }
 0x938   :  { %v836_v51 = vadd.f32 1.0, %v2695_v29  ;;  %v2697_v37 = vpop.eup %2696 }
 0x939   :  { %v860_v42 = vadd.f32 1.0, %v2697_v37 }
 0x93a   :  { %2698 = vrcp.f32 %v836_v51 }
 0x93b   :  { %2700 = vrcp.f32 %v860_v42 }
 0x944   :  { %v2699_v39 = vpop.eup %2698 }
 0x945   :  { %v2701_v44 = vpop.eup %2700  ;;  %v840_v47 = vmul.f32 %v2699_v39, %v3019_v9 }
 0x946   :  { %v864_v52 = vmul.f32 %v2701_v44, %v3023_v14 }
 0x999   :  { %v843_v40 = vpop.permute.xlu0 %842 }
 0x99a   :  { %v845_v41 = vmul.f32 %v2699_v39, %v843_v40 }
 0x99c   :  { %847 = vrot.lane.b32.xlu0 %v845_v41, %s2797_s30 }
 0x9a9   :  { %v867_v45 = vpop.permute.xlu1 %866 }
 0x9aa   :  { %v869_v46 = vmul.f32 %v2701_v44, %v867_v45 }
 0x9ac   :  { %871 = vrot.lane.b32.xlu1 %v869_v46, %s2797_s30 }
 0xa0e   :  { %v848_v49 = vpop.permute.xlu0 %847 }
 0xa0f   :  { %v3057_v50 = vadd.f32 %v848_v49, %v840_v47  ;;  %v159_v47 = vadd.f32 %v2950_v53, %v2868_v13 }
 0xa11   :  { %2702 = vtanh.f32 %v3057_v50 }
 0xa1b   :  { %v2703_v57 = vpop.eup %2702 }
 0xa1c   :  { %853 = vrot.lane.b32.xlu0 %v2703_v57, %s2797_s30 }
 0xa1e   :  { %v872_v58 = vpop.permute.xlu1 %871 }
 0xa1f   :  { %v3062_v59 = vadd.f32 %v872_v58, %v864_v52 }
 0xa21   :  { %2704 = vtanh.f32 %v3062_v59 }
 0xa2b   :  { %v2705_v61 = vpop.eup %2704 }
 0xa2c   :  { %877 = vrot.lane.b32.xlu1 %v2705_v61, %s2797_s30 }
 0xa8e   :  { %v854_v62 = vpop.permute.xlu0 %853 }
 0xa8f   :  { %v856_v63 = vmul.f32 %v2699_v39, %v854_v62 }
 0xa91   :  { %882 = vrot.lane.b32.xlu0 %v856_v63, %s2798_s0 }
 0xa9e   :  { %v878_v1 = vpop.permute.xlu1 %877 }
 0xa9f   :  { %v880_v2 = vmul.f32 %v2701_v44, %v878_v1 }
 0xaa1   :  { %959 = vrot.lane.b32.xlu1 %v880_v2, %s2799_s1 }
 0xb03   :  { %v883_v3 = vpop.permute.xlu0 %882 }
 0xb04   :  { %2339 = vmatmul.mubr.msk.f32.vlgmr.msra.gmra.mrb[12].mxu0 %vm172_vm2, %v883_v3 }
 0xb05   :  { %2552 = vmatpush3.bf16.msra.mxu0 %v2887_v33  ;;  %2357 = vmatprep.mubr.msk.f32.mxu0 %vm2795_vm1, %v2796_v4 }
 0xb06   :  { %2553 = vmatprep.subr.bf16.mxu0 %v2794_v0 }
 0xb09   :  { %2555 = vmatpush3.bf16.msra.mxu0 %v2904_v38 }
 0xb0a   :  { %2556 = vmatprep.subr.bf16.mxu0 %v2794_v0 }
 0xb0d   :  { %2558 = vmatpush3.bf16.msra.mxu0 %v2922_v43 }
 0xb0e   :  { %2559 = vmatprep.subr.bf16.mxu0 %v2794_v0 }
 0xb11   :  { %2561 = vmatpush3.bf16.msra.mxu0 %v2938_v48 }
 0xb12   :  { %2580 = vmatprep.subr.bf16.mxu0 %v2794_v0 }
 0xb13   :  { %v960_v5 = vpop.permute.xlu1 %959 }
 0xb14   :  { %v962_v6 = vsel %vm172_vm2, %v883_v3, %v960_v5 }
 0xb15   :  { %2358 = vmatmul.mubr.msk.f32.vlgmr.msra.gmra.mrb[14].mxu0 %vm353_vm3, %v962_v6 }
 0xb16   :  { %2582 = vmatpush3.bf16.msra.mxu0 %v2838_v8  ;;  %2398 = vmatprep.mubr.msk.f32.mxu0 %vm2795_vm1, %v2796_v4 }
 0xb17   :  { %2583 = vmatprep.subr.bf16.mxu0 %v2794_v0 }
 0xb1a   :  { %2585 = vmatpush3.bf16.msra.mxu0 %v2851_v12 }
 0xb1b   :  { %2586 = vmatprep.subr.bf16.mxu0 %v2794_v0 }
 0xbd7   :  { %v952_v9 = vpop.f32.mrb[12].mxu0 }
 0xbd8   :  { %v956_v10 = vadd.f32 %v952_v9, %v154_v7  ;;  %v2340_v11 = vpop.f32.mrb[13].mxu0 }
 0xbda   :  { %2706 = vtanh.f32 %v956_v10  ;;  %v2066_v19 = vmul.f32 -1.442695, %v956_v10 }
 0xbe4   :  { %v2707_v14 = vpop.eup %2706 }
 0xbe5   :  { %1045 = vrot.lane.b32.xlu0 %v2707_v14, %s2797_s30 }
 0xbe8   :  { %v1032_v15 = vpop.f32.mrb[14].mxu0 }
 0xbe9   :  { %v1033_v16 = vadd.f32 %v2982_v60, %v1032_v15  ;;  %v2359_v17 = vpop.f32.mrb[15].mxu0 }
 0xbeb   :  { %2708 = vtanh.f32 %v1033_v16  ;;  %v2067_v54 = vmul.f32 -1.442695, %v1033_v16 }
 0xbec   :  { %2710 = vpow2.f32 %v2066_v19 }
 0xbf5   :  { %v2709_v18 = vpop.eup %2708 }
 0xbf6   :  { %1069 = vrot.lane.b32.xlu1 %v2709_v18, %s2797_s30  ;;  %v2711_v20 = vpop.eup %2710 }
 0xbf7   :  { %v1039_v21 = vadd.f32 1.0, %v2711_v20 }
 0xbf9   :  { %2712 = vrcp.f32 %v1039_v21 }
 0xbfa   :  { %2714 = vpow2.f32 %v2067_v54 }
 0xc03   :  { %v2713_v22 = vpop.eup %2712 }
 0xc04   :  { %v2715_v23 = vpop.eup %2714  ;;  %v1043_v31 = vmul.f32 %v2713_v22, %v3057_v50 }
 0xc05   :  { %v1063_v26 = vadd.f32 1.0, %v2715_v23 }
 0xc07   :  { %2716 = vrcp.f32 %v1063_v26 }
 0xc11   :  { %v2717_v27 = vpop.eup %2716 }
 0xc12   :  { %v1067_v29 = vmul.f32 %v2717_v27, %v3062_v59 }
 0xc57   :  { %v1046_v24 = vpop.permute.xlu0 %1045 }
 0xc58   :  { %v1048_v25 = vmul.f32 %v2713_v22, %v1046_v24 }
 0xc5a   :  { %1050 = vrot.lane.b32.xlu0 %v1048_v25, %s2797_s30 }
 0xc68   :  { %v1070_v28 = vpop.permute.xlu1 %1069 }
 0xc69   :  { %v1072_v30 = vmul.f32 %v2717_v27, %v1070_v28 }
 0xc6b   :  { %1074 = vrot.lane.b32.xlu1 %v1072_v30, %s2797_s30 }
 0xccc   :  { %v1051_v32 = vpop.permute.xlu0 %1050 }
 0xccd   :  { %v3095_v34 = vadd.f32 %v1051_v32, %v1043_v31 }
 0xccf   :  { %2718 = vtanh.f32 %v3095_v34 }
 0xcd9   :  { %v2719_v35 = vpop.eup %2718 }
 0xcda   :  { %1056 = vrot.lane.b32.xlu0 %v2719_v35, %s2797_s30 }
 0xcdd   :  { %v1075_v36 = vpop.permute.xlu1 %1074 }
 0xcde   :  { %v3100_v51 = vadd.f32 %v1075_v36, %v1067_v29 }
 0xce0   :  { %2720 = vtanh.f32 %v3100_v51 }
 0xcea   :  { %v2721_v37 = vpop.eup %2720 }
 0xceb   :  { %1080 = vrot.lane.b32.xlu1 %v2721_v37, %s2797_s30 }
 0xd4c   :  { %v1057_v39 = vpop.permute.xlu0 %1056 }
 0xd4d   :  { %v1059_v40 = vmul.f32 %v2713_v22, %v1057_v39 }
 0xd4f   :  { %1085 = vrot.lane.b32.xlu0 %v1059_v40, %s2798_s0 }
 0xd5d   :  { %v1081_v41 = vpop.permute.xlu1 %1080 }
 0xd5e   :  { %v1083_v42 = vmul.f32 %v2717_v27, %v1081_v41  ;;  %v164_v27 = vadd.f32 %v2868_v13, %v2956_v56 }
 0xd60   :  { %1162 = vrot.lane.b32.xlu1 %v1083_v42, %s2799_s1 }
 0xdc1   :  { %v1086_v44 = vpop.permute.xlu0 %1085 }
 0xdc2   :  { %2369 = vmatmul.mubr.msk.f32.vlgmr.msra.gmra.mrb[10].mxu1 %vm172_vm2, %v1086_v44 }
 0xdc3   :  { %2570 = vmatpush3.bf16.msra.mxu1 %v2887_v33  ;;  %2387 = vmatprep.mubr.msk.f32.mxu1 %vm2795_vm1, %v2796_v4 }
 0xdc4   :  { %2571 = vmatprep.subr.bf16.mxu1 %v2794_v0 }
 0xdc7   :  { %2573 = vmatpush3.bf16.msra.mxu1 %v2904_v38 }
 0xdc8   :  { %2574 = vmatprep.subr.bf16.mxu1 %v2794_v0 }
 0xdcb   :  { %2576 = vmatpush3.bf16.msra.mxu1 %v2922_v43 }
 0xdcc   :  { %2577 = vmatprep.subr.bf16.mxu1 %v2794_v0 }
 0xdcf   :  { %2579 = vmatpush3.bf16.msra.mxu1 %v2938_v48 }
 0xdd0   :  { %2598 = vmatprep.subr.bf16.mxu1 %v2794_v0 }
 0xdd2   :  { %v1163_v45 = vpop.permute.xlu1 %1162 }
 0xdd3   :  { %v1165_v46 = vsel %vm172_vm2, %v1086_v44, %v1163_v45 }
 0xdd4   :  { %2388 = vmatmul.mubr.msk.f32.vlgmr.msra.gmra.mrb[12].mxu1 %vm353_vm3, %v1165_v46 }
 0xdd5   :  { %2600 = vmatpush3.bf16.msra.mxu1 %v2838_v8  ;;  %2428 = vmatprep.mubr.msk.f32.mxu1 %vm2795_vm1, %v2796_v4 }
 0xdd6   :  { %2601 = vmatprep.subr.bf16.mxu1 %v2794_v0 }
 0xdd9   :  { %2603 = vmatpush3.bf16.msra.mxu1 %v2851_v12 }
 0xdda   :  { %2604 = vmatprep.subr.bf16.mxu1 %v2794_v0 }
 0xe95   :  { %v1155_v49 = vpop.f32.mrb[10].mxu1 }
 0xe96   :  { %v1159_v50 = vadd.f32 %v1155_v49, %v159_v47  ;;  %v2370_v57 = vpop.f32.mrb[11].mxu1 }
 0xe98   :  { %2722 = vtanh.f32 %v1159_v50  ;;  %v2070_v12 = vmul.f32 -1.442695, %v1159_v50 }
 0xea2   :  { %v2723_v52 = vpop.eup %2722 }
 0xea3   :  { %1248 = vrot.lane.b32.xlu0 %v2723_v52, %s2797_s30 }
 0xea7   :  { %v1235_v8 = vpop.f32.mrb[12].mxu1 }
 0xea8   :  { %v1236_v58 = vadd.f32 %v2982_v60, %v1235_v8  ;;  %v2389_v59 = vpop.f32.mrb[13].mxu1 }
 0xeaa   :  { %2724 = vtanh.f32 %v1236_v58  ;;  %v2071_v53 = vmul.f32 -1.442695, %v1236_v58 }
 0xeab   :  { %2726 = vpow2.f32 %v2070_v12 }
 0xeb4   :  { %v2725_v61 = vpop.eup %2724 }
 0xeb5   :  { %1272 = vrot.lane.b32.xlu1 %v2725_v61, %s2797_s30  ;;  %v2727_v62 = vpop.eup %2726 }
 0xeb6   :  { %v1242_v63 = vadd.f32 1.0, %v2727_v62 }
 0xeb8   :  { %2728 = vrcp.f32 %v1242_v63 }
 0xeb9   :  { %2730 = vpow2.f32 %v2071_v53 }
 0xec2   :  { %v2729_v1 = vpop.eup %2728 }
 0xec3   :  { %v2731_v3 = vpop.eup %2730  ;;  %v1246_v11 = vmul.f32 %v2729_v1, %v3095_v34 }
 0xec4   :  { %v1266_v6 = vadd.f32 1.0, %v2731_v3 }
 0xec6   :  { %2732 = vrcp.f32 %v1266_v6 }
 0xed0   :  { %v2733_v7 = vpop.eup %2732 }
 0xed1   :  { %v1270_v17 = vmul.f32 %v2733_v7, %v3100_v51 }
 0xf15   :  { %v1249_v2 = vpop.permute.xlu0 %1248 }
 0xf16   :  { %v1251_v5 = vmul.f32 %v2729_v1, %v1249_v2 }
 0xf18   :  { %1253 = vrot.lane.b32.xlu0 %v1251_v5, %s2797_s30 }
 0xf27   :  { %v1273_v9 = vpop.permute.xlu1 %1272 }
 0xf28   :  { %v1275_v10 = vmul.f32 %v2733_v7, %v1273_v9 }
 0xf2a   :  { %1277 = vrot.lane.b32.xlu1 %v1275_v10, %s2797_s30 }
 0xf8a   :  { %v1254_v14 = vpop.permute.xlu0 %1253 }
 0xf8b   :  { %v3133_v15 = vadd.f32 %v1254_v14, %v1246_v11 }
 0xf8d   :  { %2734 = vtanh.f32 %v3133_v15 }
 0xf97   :  { %v2735_v16 = vpop.eup %2734 }
 0xf98   :  { %1259 = vrot.lane.b32.xlu0 %v2735_v16, %s2797_s30 }
 0xf9c   :  { %v1278_v18 = vpop.permute.xlu1 %1277 }
 0xf9d   :  { %v3138_v19 = vadd.f32 %v1278_v18, %v1270_v17 }
 0xf9f   :  { %2736 = vtanh.f32 %v3138_v19 }
 0xfa9   :  { %v2737_v20 = vpop.eup %2736 }
 0xfaa   :  { %1283 = vrot.lane.b32.xlu1 %v2737_v20, %s2797_s30 }
0x100a   :  { %v1260_v21 = vpop.permute.xlu0 %1259 }
0x100b   :  { %v1262_v54 = vmul.f32 %v2729_v1, %v1260_v21 }
0x100d   :  { %1288 = vrot.lane.b32.xlu0 %v1262_v54, %s2798_s0 }
0x101c   :  { %v1284_v22 = vpop.permute.xlu1 %1283 }
0x101d   :  { %v1286_v23 = vmul.f32 %v2733_v7, %v1284_v22 }
0x101f   :  { %1365 = vrot.lane.b32.xlu1 %v1286_v23, %s2799_s1 }
0x107f   :  { %v1289_v24 = vpop.permute.xlu0 %1288 }
0x1080   :  { %2399 = vmatmul.mubr.msk.f32.vlgmr.msra.gmra.mrb[16].mxu0 %vm172_vm2, %v1289_v24 }
0x1081   :  { %2588 = vmatpush3.bf16.msra.mxu0 %v2887_v33  ;;  %2417 = vmatprep.mubr.msk.f32.mxu0 %vm2795_vm1, %v2796_v4 }
0x1082   :  { %2589 = vmatprep.subr.bf16.mxu0 %v2794_v0 }
0x1085   :  { %2591 = vmatpush3.bf16.msra.mxu0 %v2904_v38 }
0x1086   :  { %2592 = vmatprep.subr.bf16.mxu0 %v2794_v0 }
0x1089   :  { %2594 = vmatpush3.bf16.msra.mxu0 %v2922_v43 }
0x108a   :  { %2595 = vmatprep.subr.bf16.mxu0 %v2794_v0 }
0x108d   :  { %2597 = vmatpush3.bf16.msra.mxu0 %v2938_v48 }
0x108e   :  { %2616 = vmatprep.subr.bf16.mxu0 %v2794_v0 }
0x1091   :  { %v1366_v25 = vpop.permute.xlu1 %1365 }
0x1092   :  { %v1368_v26 = vsel %vm172_vm2, %v1289_v24, %v1366_v25 }
0x1093   :  { %2418 = vmatmul.mubr.msk.f32.vlgmr.msra.gmra.mrb[18].mxu0 %vm353_vm3, %v1368_v26 }
0x1094   :  { %2618 = vmatpush3.bf16.msra.mxu0 %v2887_v33  ;;  %2466 = vmatprep.mubr.msk.f32.mxu0 %vm2795_vm1, %v2796_v4 }
0x1095   :  { %2619 = vmatprep.subr.bf16.mxu0 %v2794_v0 }
0x1098   :  { %2621 = vmatpush3.bf16.msra.mxu0 %v2904_v38 }
0x1099   :  { %2622 = vmatprep.subr.bf16.mxu0 %v2794_v0 }
0x109c   :  { %2624 = vmatpush3.bf16.msra.mxu0 %v2922_v43 }
0x109d   :  { %2625 = vmatprep.subr.bf16.mxu0 %v2794_v0 }
0x10a0   :  { %2627 = vmatpush3.bf16.msra.mxu0 %v2938_v48 }
0x1153   :  { %v1358_v28 = vpop.f32.mrb[16].mxu0 }
0x1154   :  { %v1362_v30 = vadd.f32 %v1358_v28, %v164_v27  ;;  %v2400_v31 = vpop.f32.mrb[17].mxu0 }
0x1156   :  { %2738 = vtanh.f32 %v1362_v30  ;;  %v2074_v51 = vmul.f32 -1.442695, %v1362_v30 }
0x1160   :  { %v2739_v32 = vpop.eup %2738 }
0x1161   :  { %1451 = vrot.lane.b32.xlu0 %v2739_v32, %s2797_s30 }
0x1166   :  { %v1438_v34 = vpop.f32.mrb[18].mxu0 }
0x1167   :  { %v1439_v35 = vadd.f32 %v2982_v60, %v1438_v34  ;;  %v2419_v29 = vpop.f32.mrb[19].mxu0 }
0x1169   :  { %2740 = vtanh.f32 %v1439_v35  ;;  %v2075_v56 = vmul.f32 -1.442695, %v1439_v35 }
0x116a   :  { %2742 = vpow2.f32 %v2074_v51 }
0x1173   :  { %v2741_v36 = vpop.eup %2740 }
0x1174   :  { %1475 = vrot.lane.b32.xlu1 %v2741_v36, %s2797_s30  ;;  %v2743_v37 = vpop.eup %2742 }
0x1175   :  { %v1445_v39 = vadd.f32 1.0, %v2743_v37 }
0x1177   :  { %2744 = vrcp.f32 %v1445_v39 }
0x1178   :  { %2746 = vpow2.f32 %v2075_v56 }
0x1181   :  { %v2745_v40 = vpop.eup %2744 }
0x1182   :  { %v2747_v44 = vpop.eup %2746  ;;  %v1449_v50 = vmul.f32 %v2745_v40, %v3133_v15 }
0x1183   :  { %v1469_v45 = vadd.f32 1.0, %v2747_v44 }
0x1185   :  { %2748 = vrcp.f32 %v1469_v45 }
0x118f   :  { %v2749_v46 = vpop.eup %2748 }
0x1190   :  { %v1473_v58 = vmul.f32 %v2749_v46, %v3138_v19 }
0x11d3   :  { %v1452_v41 = vpop.permute.xlu0 %1451 }
0x11d4   :  { %v1454_v42 = vmul.f32 %v2745_v40, %v1452_v41 }
0x11d6   :  { %1456 = vrot.lane.b32.xlu0 %v1454_v42, %s2797_s30 }
0x11e6   :  { %v1476_v47 = vpop.permute.xlu1 %1475 }
0x11e7   :  { %v1478_v49 = vmul.f32 %v2749_v46, %v1476_v47 }
0x11e9   :  { %1480 = vrot.lane.b32.xlu1 %v1478_v49, %s2797_s30  ;;  %v1799_v49 = vld [vmem:[%s3276_s2] sm:$0xff] }
0x1248   :  { %v1457_v57 = vpop.permute.xlu0 %1456 }
0x1249   :  { %v1459_v52 = vadd.f32 %v1457_v57, %v1449_v50  ;;  %v1802_v50 = vld [vmem:[%s3276_s2 + $0x18] sm:$0xff] }
0x124b   :  { %2750 = vtanh.f32 %v1459_v52 }
0x1255   :  { %v2751_v8 = vpop.eup %2750 }
0x1256   :  { %1462 = vrot.lane.b32.xlu0 %v2751_v8, %s2797_s30 }
0x125b   :  { %v1481_v59 = vpop.permute.xlu1 %1480 }
0x125c   :  { %v1483_v61 = vadd.f32 %v1481_v59, %v1473_v58  ;;  %v1806_v59 = vld [vmem:[%s3276_s2 + $0x2a] sm:$0x1] }
0x125e   :  { %2752 = vtanh.f32 %v1483_v61 }
0x1268   :  { %v2753_v12 = vpop.eup %2752 }
0x1269   :  { %1486 = vrot.lane.b32.xlu1 %v2753_v12, %s2797_s30  ;;  %v1803_v12 = vld [vmem:[%s3276_s2 + $0x20] sm:$0xff] }
0x12c8   :  { %v1463_v62 = vpop.permute.xlu0 %1462 }
0x12c9   :  { %v1465_v63 = vmul.f32 %v2745_v40, %v1463_v62 }
0x12cb   :  { %1491 = vrot.lane.b32.xlu0 %v1465_v63, %s2798_s0 }
0x12db   :  { %v1487_v53 = vpop.permute.xlu1 %1486 }
0x12dc   :  { %v1489_v1 = vmul.f32 %v2749_v46, %v1487_v53 }
0x12de   :  { %1568 = vrot.lane.b32.xlu1 %v1489_v1, %s2799_s1 }
0x133d   :  { %v1492_v2 = vpop.permute.xlu0 %1491 }
0x133e   :  { %2429 = vmatmul.mubr.msk.f32.vlgmr.msra.gmra.mrb[14].mxu1 %vm172_vm2, %v1492_v2 }
0x133f   :  { %2606 = vmatpush3.bf16.msra.mxu1 %v2887_v33  ;;  %2447 = vmatprep.mubr.msk.f32.mxu1 %vm2795_vm1, %v2796_v4 }
0x1340   :  { %2607 = vmatprep.subr.bf16.mxu1 %v2794_v0 }
0x1343   :  { %2609 = vmatpush3.bf16.msra.mxu1 %v2904_v38  ;;  %v169_v38 = vadd.f32 %v2954_v55, %v2868_v13 }
0x1344   :  { %2610 = vmatprep.subr.bf16.mxu1 %v2794_v0 }
0x1347   :  { %2612 = vmatpush3.bf16.msra.mxu1 %v2922_v43 }
0x1348   :  { %2613 = vmatprep.subr.bf16.mxu1 %v2794_v0 }
0x134b   :  { %2615 = vmatpush3.bf16.msra.mxu1 %v2938_v48 }
0x134c   :  { %2628 = vmatprep.subr.bf16.mxu1 %v2794_v0 }
0x1350   :  { %v1569_v3 = vpop.permute.xlu1 %1568 }
0x1351   :  { %v1571_v33 = vsel %vm172_vm2, %v1492_v2, %v1569_v3 }
0x1352   :  { %2448 = vmatmul.mubr.msk.f32.vlgmr.msra.gmra.mrb[16].mxu1 %vm353_vm3, %v1571_v33 }
0x1353   :  { %2477 = vmatprep.mubr.msk.f32.mxu1 %vm2795_vm1, %v2796_v4 }
0x1411   :  { %v1561_v5 = vpop.f32.mrb[14].mxu1 }
0x1412   :  { %v1565_v6 = vadd.f32 %v1561_v5, %v169_v38  ;;  %v2430_v43 = vpop.f32.mrb[15].mxu1  ;;  %v1829_v5 = vlaneseq }
0x1414   :  { %2754 = vtanh.f32 %v1565_v6  ;;  %v2078_v14 = vmul.f32 -1.442695, %v1565_v6 }
0x141e   :  { %v2755_v7 = vpop.eup %2754 }
0x141f   :  { %1654 = vrot.lane.b32.xlu0 %v2755_v7, %s2797_s30 }
0x1425   :  { %v1641_v48 = vpop.f32.mrb[16].mxu1 }
0x1426   :  { %v1642_v9 = vadd.f32 %v2982_v60, %v1641_v48  ;;  %v2449_v10 = vpop.f32.mrb[17].mxu1  ;;  %v1830_v48 = vshrl.u32 %v1829_v5, 7 }
0x1428   :  { %2756 = vtanh.f32 %v1642_v9  ;;  %v2079_v13 = vmul.f32 -1.442695, %v1642_v9 }
0x1429   :  { %2758 = vpow2.f32 %v2078_v14 }
0x1432   :  { %v2757_v11 = vpop.eup %2756 }
0x1433   :  { %1678 = vrot.lane.b32.xlu1 %v2757_v11, %s2797_s30  ;;  %v2759_v4 = vpop.eup %2758 }
0x1434   :  { %v1648_v15 = vadd.f32 1.0, %v2759_v4  ;;  %v1831_v4 = vsub.s32 0, %v1830_v48 }
0x1436   :  { %2760 = vrcp.f32 %v1648_v15 }
0x1437   :  { %2762 = vpow2.f32 %v2079_v13 }
0x1440   :  { %v2761_v55 = vpop.eup %2760 }
0x1441   :  { %v2763_v18 = vpop.eup %2762  ;;  %v1652_v22 = vmul.f32 %v2761_v55, %v1459_v52 }
0x1442   :  { %v1672_v19 = vadd.f32 1.0, %v2763_v18 }
0x1444   :  { %2764 = vrcp.f32 %v1672_v19 }
0x144e   :  { %v2765_v20 = vpop.eup %2764 }
0x144f   :  { %v1676_v26 = vmul.f32 %v2765_v20, %v1483_v61  ;;  %v1801_v61 = vld [vmem:[%s3276_s2 + $0x10] sm:$0xff] }
0x1491   :  { %v1655_v16 = vpop.permute.xlu0 %1654 }
0x1492   :  { %v1657_v17 = vmul.f32 %v2761_v55, %v1655_v16 }
0x1494   :  { %1659 = vrot.lane.b32.xlu0 %v1657_v17, %s2797_s30 }
0x14a5   :  { %v1679_v21 = vpop.permute.xlu1 %1678 }
0x14a6   :  { %v1681_v54 = vmul.f32 %v2765_v20, %v1679_v21 }
0x14a8   :  { %1683 = vrot.lane.b32.xlu1 %v1681_v54, %s2797_s30 }
0x1506   :  { %v1660_v23 = vpop.permute.xlu0 %1659 }
0x1507   :  { %v1662_v24 = vadd.f32 %v1660_v23, %v1652_v22 }
0x1509   :  { %2766 = vtanh.f32 %v1662_v24 }
0x1513   :  { %v2767_v25 = vpop.eup %2766 }
0x1514   :  { %1665 = vrot.lane.b32.xlu0 %v2767_v25, %s2797_s30 }
0x151a   :  { %v1684_v27 = vpop.permute.xlu1 %1683 }
0x151b   :  { %v1686_v28 = vadd.f32 %v1684_v27, %v1676_v26 }
0x151d   :  { %2768 = vtanh.f32 %v1686_v28 }
0x1527   :  { %v2769_v30 = vpop.eup %2768 }
0x1528   :  { %1689 = vrot.lane.b32.xlu1 %v2769_v30, %s2797_s30 }
0x1586   :  { %v1666_v31 = vpop.permute.xlu0 %1665 }
0x1587   :  { %v1668_v32 = vmul.f32 %v2761_v55, %v1666_v31 }
0x1589   :  { %1694 = vrot.lane.b32.xlu0 %v1668_v32, %s2798_s0 }
0x159a   :  { %v1690_v34 = vpop.permute.xlu1 %1689 }
0x159b   :  { %v1692_v35 = vmul.f32 %v2765_v20, %v1690_v34 }
0x159d   :  { %1698 = vrot.lane.b32.xlu1 %v1692_v35, %s2799_s1 }
0x15fb   :  { %v1695_v29 = vpop.permute.xlu0 %1694 }
0x160f   :  { %v1699_v36 = vpop.permute.xlu1 %1698 }
0x1610   :  { %v1701_v51 = vsel %vm172_vm2, %v1695_v29, %v1699_v36 }
0x1611   :  { %2467 = vmatmul.mubr.msk.f32.vlgmr.msra.gmra.mrb[20].mxu0 %vm353_vm3, %v1701_v51 }
0x16e4   :  { %v1771_v37 = vpop.f32.mrb[20].mxu0 }
0x16e5   :  { %v1772_v39 = vadd.f32 %v2982_v60, %v1771_v37  ;;  %v2468_v56 = vpop.f32.mrb[21].mxu0  ;;  %v1800_v60 = vld [vmem:[%s3276_s2 + $0x8] sm:$0xff] }
0x16e7   :  { %2770 = vtanh.f32 %v1772_v39  ;;  %v2081_v41 = vmul.f32 -1.442695, %v1772_v39 }
0x16e9   :  { %2772 = vpow2.f32 %v2081_v41 }
0x16f1   :  { %v2771_v40 = vpop.eup %2770 }
0x16f2   :  { %1784 = vrot.lane.b32.xlu0 %v2771_v40, %s2797_s30 }
0x16f3   :  { %v2773_v42 = vpop.eup %2772 }
0x16f4   :  { %v1778_v44 = vadd.f32 1.0, %v2773_v42 }
0x16f6   :  { %2774 = vrcp.f32 %v1778_v44 }
0x1700   :  { %v2775_v45 = vpop.eup %2774 }
0x1701   :  { %v1782_v57 = vmul.f32 %v2775_v45, %v1686_v28 }
0x1764   :  { %v1785_v46 = vpop.permute.xlu0 %1784 }
0x1765   :  { %v1787_v47 = vmul.f32 %v2775_v45, %v1785_v46 }
0x1767   :  { %1789 = vrot.lane.b32.xlu1 %v1787_v47, %s2797_s30 }
0x176b   :  { %1809 = vrot.lane.b32.xlu1 %v1799_v49, %s2798_s0 }
0x176f   :  { %1837 = vrot.lane.b32.xlu1 %v1800_v60, %s2798_s0 }
0x1773   :  { %1841 = vrot.lane.b32.xlu1 %v1802_v50, %s2798_s0 }
0x17d9   :  { %v1790_v52 = vpop.permute.xlu1 %1789 }
0x17da   :  { %v1792_v8 = vadd.f32 %v1790_v52, %v1782_v57 }
0x17dc   :  { %2776 = vtanh.f32 %v1792_v8 }
0x17dd   :  { %v1810_v63 = vpop.permute.xlu1 %1809 }
0x17e1   :  { %v1838_v11 = vpop.permute.xlu1 %1837 }
0x17e5   :  { %v1842_v16 = vpop.permute.xlu1 %1841 }
0x17e6   :  { %v2777_v58 = vpop.eup %2776 }
0x17e7   :  { %1795 = vrot.lane.b32.xlu0 %v2777_v58, %s2797_s30 }
0x17eb   :  { %1822 = vrot.lane.b32.xlu0 %v1806_v59, %s2798_s0 }
0x17ef   :  { %1839 = vrot.lane.b32.xlu0 %v1801_v61, %s2798_s0 }
0x17f3   :  { %1843 = vrot.lane.b32.xlu0 %v1803_v12, %s2798_s0 }
0x1859   :  { %v1796_v62 = vpop.permute.xlu0 %1795 }
0x185a   :  { %v3235_v53 = vmul.f32 %v2775_v45, %v1796_v62 }
0x185c   :  { %v1812_v1 = vmul.f32 %v1810_v63, %v3235_v53 }
0x185d   :  { %v1823_v43 = vpop.permute.xlu0 %1822 }
0x185e   :  { %v1814_v2 = vsel %vm1813_vm4, %v1812_v1, 0.0 }
0x185f   :  { %v1815_v3 = vrot.slane %v1814_v2, 4 }
0x1861   :  { %v1816_v33 = vadd.f32 %v1815_v3, %v1814_v2  ;;  %v1840_v14 = vpop.permute.xlu0 %1839 }
0x1863   :  { %v1817_v38 = vrot.slane %v1816_v33, 2 }
0x1865   :  { %v1818_v6 = vadd.f32 %v1817_v38, %v1816_v33  ;;  %v1844_v17 = vpop.permute.xlu0 %1843  ;;  %v2083_v33 = vld [vmem:[%s3276_s2 + $0x28] ss:$0 sm:$0xff] }
0x1867   :  { %v1819_v7 = vrot.slane %v1818_v6, 1 }
0x1869   :  { %v1820_v9 = vadd.f32 %v1819_v7, %v1818_v6 }
0x186b   :  { %v1825_v10 = vadd.f32 %v1823_v43, %v1820_v9 }
0x186d   :  { %vm1826_vm5 = vcmp.ge.f32.partialorder %v1825_v10, 0.0  ;;  %v1827_v15 = vmul.f32 0.2, %v1825_v10 }
0x186f   :  { %v1828_v13 = vsel %vm1826_vm5, %v1825_v10, %v1827_v15 }
0x1870   :  { %v1832_v55 = vrot.slane %v1828_v13, %v1831_v4  ;;  %v2084_v4 = vld [vmem:[%s3276_s2 + $0x29] ss:$0 sm:$0xff] }
0x1872   :  { %v1849_v18 = vadd.f32 %v1838_v11, %v1832_v55  ;;  %v1850_v19 = vadd.f32 %v1840_v14, %v1832_v55  ;;  %v1851_v20 = vadd.f32 %v1842_v16, %v1832_v55  ;;  %v1852_v21 = vadd.f32 %v1844_v17, %v1832_v55 }
0x1874   :  { %v1853_v54 = vsel %vm1813_vm4, %v1849_v18, -inf  ;;  %v1856_v22 = vsel %vm1813_vm4, %v1850_v19, -inf  ;;  %v1859_v23 = vsel %vm1813_vm4, %v1851_v20, -inf  ;;  %v1862_v24 = vsel %vm1813_vm4, %v1852_v21, -inf }
0x1875   :  { %1854 = vmax.xlane.f32.xlu1 %v1853_v54  ;;  %1857 = vmax.xlane.f32.xlu0 %v1856_v22 }
0x1879   :  { %1860 = vmax.xlane.f32.xlu0 %v1859_v23  ;;  %1863 = vmax.xlane.f32.xlu1 %v1862_v24 }
0x1902   :  { %v1855_v25 = vpop.xlane.xlu1 %1854  ;;  %v1858_v26 = vpop.xlane.xlu0 %1857 }
0x1903   :  { %v1865_v27 = vsub.f32 %v1849_v18, %v1855_v25  ;;  %v1866_v28 = vsub.f32 %v1850_v19, %v1858_v26 }
0x1905   :  { %v1869_v30 = vmul.f32 1.442695, %v1865_v27  ;;  %v1871_v31 = vmul.f32 1.442695, %v1866_v28 }
0x1906   :  { %v1864_v32 = vpop.xlane.xlu1 %1863  ;;  %v1861_v34 = vpop.xlane.xlu0 %1860 }
0x1907   :  { %2778 = vpow2.f32 %v1869_v30  ;;  %v1868_v35 = vsub.f32 %v1852_v21, %v1864_v32  ;;  %v1867_v29 = vsub.f32 %v1851_v20, %v1861_v34  ;;  %v2085_v21 = vld [vmem:[%s3276_s2 + $0x2b] ss:$0 sm:$0xff] }
0x1908   :  { %2780 = vpow2.f32 %v1871_v31 }
0x1909   :  { %v1875_v36 = vmul.f32 1.442695, %v1868_v35  ;;  %v1873_v51 = vmul.f32 1.442695, %v1867_v29 }
0x190b   :  { %2782 = vpow2.f32 %v1875_v36 }
0x190c   :  { %2784 = vpow2.f32 %v1873_v51 }
0x1911   :  { %v2779_v37 = vpop.eup %2778 }
0x1912   :  { %v2781_v39 = vpop.eup %2780  ;;  %1881 = vrot.lane.b32.xlu0 %v2779_v37, %s2798_s0 }
0x1913   :  { %1883 = vrot.lane.b32.xlu1 %v2781_v39, %s2798_s0 }
0x1915   :  { %v2783_v56 = vpop.eup %2782 }
0x1916   :  { %v2785_v40 = vpop.eup %2784  ;;  %1887 = vrot.lane.b32.xlu0 %v2783_v56, %s2798_s0 }
0x1917   :  { %1885 = vrot.lane.b32.xlu1 %v2785_v40, %s2798_s0 }
0x1984   :  { %v1882_v41 = vpop.permute.xlu0 %1881 }
0x1985   :  { %v1884_v42 = vpop.permute.xlu1 %1883  ;;  %v1893_v44 = vsel %vm172_vm2, %v1882_v41, 0.0 }
0x1986   :  { %v1896_v45 = vsel %vm172_vm2, %v1884_v42, 0.0  ;;  %1894 = vadd.xlane.f32.xlu1 %v1893_v44 }
0x1987   :  { %1897 = vadd.xlane.f32.xlu0 %v1896_v45 }
0x1988   :  { %v1888_v46 = vpop.permute.xlu0 %1887 }
0x1989   :  { %v1886_v47 = vpop.permute.xlu1 %1885  ;;  %v1902_v49 = vsel %vm172_vm2, %v1888_v46, 0.0 }
0x198a   :  { %v1899_v60 = vsel %vm172_vm2, %v1886_v47, 0.0  ;;  %1903 = vadd.xlane.f32.xlu1 %v1902_v49 }
0x198b   :  { %1900 = vadd.xlane.f32.xlu0 %v1899_v60 }
0x1a13   :  { %v1895_v50 = vpop.xlane.xlu1 %1894 }
0x1a14   :  { %2786 = vrcp.f32 %v1895_v50  ;;  %v1898_v57 = vpop.xlane.xlu0 %1897 }
0x1a15   :  { %2788 = vrcp.f32 %v1898_v57 }
0x1a17   :  { %v1904_v52 = vpop.xlane.xlu1 %1903 }
0x1a18   :  { %2790 = vrcp.f32 %v1904_v52  ;;  %v1901_v8 = vpop.xlane.xlu0 %1900 }
0x1a19   :  { %2792 = vrcp.f32 %v1901_v8 }
0x1a1e   :  { %v2787_v58 = vpop.eup %2786 }
0x1a1f   :  { %v2789_v59 = vpop.eup %2788  ;;  %v1909_v61 = vmul.f32 %v2787_v58, %v2779_v37 }
0x1a20   :  { %v1910_v12 = vmul.f32 %v2789_v59, %v2781_v39 }
0x1a22   :  { %v2791_v62 = vpop.eup %2790  ;;  %v2640_v63 = vpack.i.bf16 %v1910_v12, %v1909_v61 }
0x1a23   :  { %v2793_v1 = vpop.eup %2792  ;;  %v1912_v2 = vmul.f32 %v2791_v62, %v2783_v56 }
0x1a24   :  { %2641 = vrot.lane.b32.xlu0 %v2640_v63, %s2798_s0  ;;  %v1911_v3 = vmul.f32 %v2793_v1, %v2785_v40 }
0x1a26   :  { %v2645_v38 = vpack.i.bf16 %v1912_v2, %v1911_v3 }
0x1a28   :  { %2009 = vrot.lane.b32.xlu0 %v2083_v33, %s2798_s0  ;;  %2646 = vrot.lane.b32.xlu1 %v2645_v38, %s2798_s0 }
0x1a2c   :  { %1914 = vrot.lane.b32.xlu1 %v3235_v53, %s2798_s0 }
0x1a96   :  { %v2642_v5 = vpop.permute.xlu0 %2641 }
0x1a97   :  { %v2644_v6 = vunpack.i.h.bf16 %v2642_v5  ;;  %v2643_v43 = vunpack.i.l.bf16 %v2642_v5 }
0x1a99   :  { %v2629_v7 = vpack.c.bf16 %v2644_v6, %v2643_v43 }
0x1a9a   :  { %v2647_v48 = vpop.permute.xlu1 %2646  ;;  %v2010_v16 = vpop.permute.xlu0 %2009 }
0x1a9b   :  { %v2649_v9 = vunpack.i.h.bf16 %v2647_v48  ;;  %v2648_v10 = vunpack.i.l.bf16 %v2647_v48  ;;  %2630 = vmatpush3.bf16.msra.mxu1 %v2629_v7  ;;  %v2012_v17 = vmul.f32 %v2010_v16, %v3235_v53 }
0x1a9c   :  { %2631 = vmatprep.subr.bf16.mxu1 %v2794_v0 }
0x1a9d   :  { %v2632_v11 = vpack.c.bf16 %v2649_v9, %v2648_v10 }
0x1a9e   :  { %v1915_v14 = vpop.permute.xlu1 %1914 }
0x1a9f   :  { %2633 = vmatpush3.bf16.msra.mxu1 %v2632_v11 }
0x1aa2   :  { %2478 = vmatmul.mubr.msk.f32.vlgmr.msra.gmra.mrb[18].mxu1 %vm172_vm2, %v1915_v14 }
0x1b75   :  { %v2000_v15 = vpop.f32.mrb[18].mxu1 }
0x1b76   :  { %v2017_v13 = vmul.f32 %v2084_v4, %v2000_v15  ;;  %v2479_v55 = vpop.f32.mrb[19].mxu1 }
0x1b78   :  { %2019 = vrot.lane.b32.xlu1 %v2017_v13, %s2798_s0 }
0x1bea   :  { %v2020_v18 = vpop.permute.xlu1 %2019 }
0x1beb   :  { %v2022_v19 = vadd.f32 %v2020_v18, %v2012_v17 }
0x1bed   :  { %2024 = vrot.lane.b32.xlu0 %v2022_v19, %s2798_s0 }
0x1c5f   :  { %v2025_v0 = vpop.permute.xlu0 %2024 }
0x1c60   :  { %v2027_v20 = vsel %vm172_vm2, %v2025_v0, 0.0 }
0x1c61   :  { %2028 = vadd.xlane.f32.xlu1 %v2027_v20 }
0x1cee   :  { %v2029_v54 = vpop.xlane.xlu1 %2028 }
0x1cef   :  { %v2034_v22 = vadd.f32 %v2085_v21, %v2029_v54 }
0x1cf1   :  { %2036 = vst.msk [vmem:[%s3277_s3] sm:$0xff] %vm2035_vm6, %v2034_v22 }

</bundles_post_ra>
